<compile_context>
chip_gen: v5e
topology: v5e:2x2
jax: 0.10.0
libtpu: 0.0.40
codegen_flags: <defaults>
</compile_context>

<pallas_src>
import functools

import jax
import jax.numpy as jnp
from jax.experimental import pallas as pl
from jax.experimental.pallas import tpu as pltpu


def _round_up(x, m):
    return ((x + m - 1) // m) * m


def _row_tile_base():
    """Row-tile size per TPU generation (v7x has 64 MiB VMEM -> smaller tiles)."""
    try:
        kind = jax.devices()[0].device_kind.lower()
    except Exception:
        return 256
    if "v5" in kind or "v6" in kind:
        return 512          # 128 MiB physical VMEM
    return 256              # v7x / unknown: conservative


# ---------------------------------------------------------------------------
# Pallas kernel: fused normalize + correlations + centered-product reductions,
# tiled over rows of the P x P correlation matrices.
# ---------------------------------------------------------------------------
def _corr_loss_kernel(f1_ref, f2_ref, c1_ref, c2_ref, o_ref, *, inv_p):
    eps = jnp.float32(1e-10)

    f1 = f1_ref[...].astype(jnp.float32)   # [TM, Cf]   (row tile of map-1 feats)
    f2 = f2_ref[...].astype(jnp.float32)   # [Cf, Pp]   (all map-2 feats)
    c1 = c1_ref[...].astype(jnp.float32)   # [TM, Dc]
    c2 = c2_ref[...].astype(jnp.float32)   # [Dc, Pp]

    # F.normalize(t, dim=1): v / max(||v||, eps) == v * rsqrt(max(||v||^2, eps^2)).
    def inv_norm(sumsq):
        return jax.lax.rsqrt(jnp.maximum(sumsq, eps * eps))

    f1n = (f1 * inv_norm(jnp.sum(f1 * f1, axis=-1, keepdims=True))).astype(jnp.bfloat16)
    f2n = (f2 * inv_norm(jnp.sum(f2 * f2, axis=0, keepdims=True))).astype(jnp.bfloat16)
    c1n = (c1 * inv_norm(jnp.sum(c1 * c1, axis=-1, keepdims=True))).astype(jnp.bfloat16)
    c2n = (c2 * inv_norm(jnp.sum(c2 * c2, axis=0, keepdims=True))).astype(jnp.bfloat16)

    # tensor_correlation: einsum('nchw,ncij->nhwij')  ==  (per n)  [P,C] @ [C,P]
    fd = jnp.dot(f1n, f2n, preferred_element_type=jnp.float32)   # [TM, Pp]
    cd = jnp.dot(c1n, c2n, preferred_element_type=jnp.float32)   # [TM, Pp]

    neg = -jnp.maximum(cd, 0.0)                                   # -cd.clamp(min=0)
    row_sum_fd = jnp.sum(fd, axis=-1, keepdims=True)              # [TM, 1]
    row_sum_neg = jnp.sum(neg, axis=-1, keepdims=True)            # [TM, 1]
    row_mean_fd = row_sum_fd * inv_p                              # divide by TRUE P

    s_fd = jnp.sum(row_sum_fd)
    s_neg = jnp.sum(row_sum_neg)
    # sum(neg * (fd - rowmean)) without materializing the centered matrix:
    s_prod = jnp.sum(neg * fd) - jnp.sum(row_mean_fd * row_sum_neg)

    row = jax.lax.broadcasted_iota(jnp.int32, (8, 128), 0)
    o_ref[...] = (jnp.where(row == 0, s_fd, 0.0)
                  + jnp.where(row == 1, s_prod, 0.0)
                  + jnp.where(row == 2, s_neg, 0.0)).astype(jnp.float32)


def _partial_sums(f1m, f2m, c1m, c2m, p_true, tm):
    N, Pp, Cf = f1m.shape
    Dc = c1m.shape[-1]
    n_tiles = Pp // tm

    kernel = functools.partial(_corr_loss_kernel, inv_p=float(1.0 / p_true))

    # VMEM sizing: double-buffered inputs + output + fd/cd/neg/product temps.
    est = 4 * (2 * (tm * Cf + Cf * Pp + tm * Dc + Dc * Pp)
               + 2 * 8 * 128
               + 4 * tm * Pp)
    vmem_limit = max(int(est * 1.5), 32 * 1024 * 1024)

    return pl.pallas_call(
        kernel,
        out_shape=jax.ShapeDtypeStruct((N, n_tiles, 8, 128), jnp.float32),
        grid=(N, n_tiles),
        in_specs=[
            pl.BlockSpec((None, tm, Cf), lambda n, r: (n, r, 0)),
            pl.BlockSpec((None, Cf, Pp), lambda n, r: (n, 0, 0)),
            pl.BlockSpec((None, tm, Dc), lambda n, r: (n, r, 0)),
            pl.BlockSpec((None, Dc, Pp), lambda n, r: (n, 0, 0)),
        ],
        out_specs=pl.BlockSpec((None, None, 8, 128), lambda n, r: (n, r, 0, 0)),
        compiler_params=pltpu.CompilerParams(
            dimension_semantics=("parallel", "parallel"),
            vmem_limit_bytes=vmem_limit),
    )(f1m, f2m, c1m, c2m)


def _helper_loss(f1, f2, c1, c2):
    """Pallas-backed version of ContrastiveCorrelationLoss.helper (loss only)."""
    N, Cf, S, _ = f1.shape
    Dc = c1.shape[1]
    P = S * S

    tm = min(_row_tile_base(), _round_up(P, 128))
    Pp = _round_up(P, tm)
    pad = Pp - P

    f1m = jnp.transpose(f1, (0, 2, 3, 1)).reshape(N, P, Cf)
    c1m = jnp.transpose(c1, (0, 2, 3, 1)).reshape(N, P, Dc)
    f2m = f2.reshape(N, Cf, P)
    c2m = c2.reshape(N, Dc, P)
    if pad:
        # Zero-padded positions normalize to zero vectors -> contribute nothing.
        f1m = jnp.pad(f1m, ((0, 0), (0, pad), (0, 0)))
        c1m = jnp.pad(c1m, ((0, 0), (0, pad), (0, 0)))
        f2m = jnp.pad(f2m, ((0, 0), (0, 0), (0, pad)))
        c2m = jnp.pad(c2m, ((0, 0), (0, 0), (0, pad)))

    sums = _partial_sums(f1m, f2m, c1m, c2m, P, tm)      # [N, n_tiles, 8, 128]
    s = jnp.sum(sums[:, :, :3, 0], axis=(0, 1))          # [s_fd, s_prod, s_neg]

    total = jnp.float32(N * P * P)
    old_mean = s[0] / total                               # fd.mean()
    # fd_final = (fd - rowmean) - mean(fd - rowmean) + old_mean, and
    # mean(fd - rowmean) == 0 exactly, so:
    # loss = mean(-relu(cd) * fd_final) = (s_prod + old_mean * s_neg) / total
    return (s[1] + old_mean * s[2]) / total


# ---------------------------------------------------------------------------
# Glue: F.grid_sample(bilinear, padding_mode='border', align_corners=True),
# implemented as a dense bilinear interpolation matrix contracted on the MXU
# (avoids XLA's scalar gather path).
# ---------------------------------------------------------------------------
def _grid_sample_bilinear_border(t, grid):
    # t: [N, C, H, W] (NCHW);  grid: [N, Hg, Wg, 2] with (x, y) in [-1, 1].
    N, C, H, W = t.shape
    Hg, Wg = grid.shape[1], grid.shape[2]
    gx, gy = grid[..., 0], grid[..., 1]
    ix = jnp.clip((gx + 1.0) * 0.5 * (W - 1), 0.0, W - 1)
    iy = jnp.clip((gy + 1.0) * 0.5 * (H - 1), 0.0, H - 1)
    ix0f, iy0f = jnp.floor(ix), jnp.floor(iy)
    wx, wy = ix - ix0f, iy - iy0f
    ix0, iy0 = ix0f.astype(jnp.int32), iy0f.astype(jnp.int32)
    ix1 = jnp.minimum(ix0 + 1, W - 1)
    iy1 = jnp.minimum(iy0 + 1, H - 1)

    hw = H * W
    pos = jnp.arange(hw, dtype=jnp.int32)
    t_flat = t.reshape(N, C, hw)

    def corner(iy_, ix_, w_):
        idx = (iy_ * W + ix_).reshape(N, -1)                        # [N, P]
        return (idx[..., None] == pos).astype(t.dtype) * w_.reshape(N, -1)[..., None]

    wmat = (corner(iy0, ix0, (1 - wy) * (1 - wx))
            + corner(iy0, ix1, (1 - wy) * wx)
            + corner(iy1, ix0, wy * (1 - wx))
            + corner(iy1, ix1, wy * wx))                            # [N, P, HW]
    out = jnp.einsum('nph,nch->ncp', wmat, t_flat,
                     preferred_element_type=jnp.float32)
    return out.reshape(N, C, Hg, Wg)


# ---------------------------------------------------------------------------
# Forward pass of ContrastiveCorrelationLoss.
# ---------------------------------------------------------------------------
@functools.partial(jax.jit, static_argnames=("feature_samples",))
def contrastive_correlation_loss(orig_feats, orig_feats_pos, orig_code,
                                 orig_code_pos, key, feature_samples=40):
    N = orig_feats.shape[0]
    S = feature_samples
    k1, k2 = jax.random.split(key)
    # TODO(synk): torch.rand stream replaced with jax.random.uniform (same [-1,1) semantics).
    coords1 = jax.random.uniform(k1, (N, S, S, 2), jnp.float32) * 2.0 - 1.0
    coords2 = jax.random.uniform(k2, (N, S, S, 2), jnp.float32) * 2.0 - 1.0

    def smp(t, coords):  # sample() applies coords.permute(0, 2, 1, 3)
        return _grid_sample_bilinear_border(t, jnp.transpose(coords, (0, 2, 1, 3)))

    feats = smp(orig_feats, coords1)
    code = smp(orig_code, coords1)
    feats_pos = smp(orig_feats_pos, coords2)
    code_pos = smp(orig_code_pos, coords2)

    loss = _helper_loss(feats, feats_pos, code, code_pos)
    return loss, (feats, feats_pos, code, code_pos)


# Pure-JAX reference of helper() for a sanity check.
def _reference_loss(f1, f2, c1, c2):
    def nrm(t):
        return t / jnp.maximum(jnp.sqrt(jnp.sum(t * t, axis=1, keepdims=True)), 1e-10)

    fd = jnp.einsum('nchw,ncij->nhwij', nrm(f1), nrm(f2))
    old_mean = jnp.mean(fd)
    fd = fd - jnp.mean(fd, axis=(3, 4), keepdims=True)
    fd = fd - jnp.mean(fd) + old_mean
    cd = jnp.einsum('nchw,ncij->nhwij', nrm(c1), nrm(c2))
    return jnp.mean(-jnp.maximum(cd, 0.0) * fd)


if __name__ == "__main__":
    key = jax.random.PRNGKey(0)
    kf, kfp, kc, kcp, kcoord = jax.random.split(key, 5)

    # Small shapes: batch=2, feat channels=32, code channels=16, spatial=16x16,
    # feature_samples=8 (module default is 40; reduced for the small test).
    N, Cf, Dc, H, W = 2, 32, 16, 16, 16
    S = 8

    orig_feats = jax.random.normal(kf, (N, Cf, H, W), jnp.float32)
    orig_feats_pos = jax.random.normal(kfp, (N, Cf, H, W), jnp.float32)
    orig_code = jax.random.normal(kc, (N, Dc, H, W), jnp.float32)
    orig_code_pos = jax.random.normal(kcp, (N, Dc, H, W), jnp.float32)

    loss, sampled = contrastive_correlation_loss(
        orig_feats, orig_feats_pos, orig_code, orig_code_pos, kcoord,
        feature_samples=S)
    loss = jax.block_until_ready(loss)

    ref = _reference_loss(*sampled)
    assert bool(jnp.isfinite(loss)), "loss is not finite"
    assert float(jnp.abs(loss - ref)) < 1e-2, (float(loss), float(ref))
    print("KERNEL_OK")
</pallas_src>

<mosaic_0001>
module attributes {stable_mosaic.version = 11 : i64} {
  func.func @_corr_loss_kernel(%arg0: i32, %arg1: i32, %arg2: memref<1x128x32xf32, #tpu.memory_space<vmem>>, %arg3: memref<1x32x128xf32, #tpu.memory_space<vmem>>, %arg4: memref<1x128x16xf32, #tpu.memory_space<vmem>>, %arg5: memref<1x16x128xf32, #tpu.memory_space<vmem>>, %arg6: memref<1x1x8x128xf32, #tpu.memory_space<vmem>>) attributes {dimension_semantics = [#tpu.dimension_semantics<parallel>, #tpu.dimension_semantics<parallel>], iteration_bounds = array<i64: 2, 1>, scalar_prefetch = 0 : i64, scratch_operands = 0 : i64, tpu.core_type = #tpu.core_type<tc>, window_params = [{transform_indices = @transform_0, window_bounds = array<i64: 1, 128, 32>}, {transform_indices = @transform_1, window_bounds = array<i64: 1, 32, 128>}, {transform_indices = @transform_2, window_bounds = array<i64: 1, 128, 16>}, {transform_indices = @transform_3, window_bounds = array<i64: 1, 16, 128>}, {transform_indices = @transform_4, window_bounds = array<i64: 1, 1, 8, 128>}]} {
    %c0 = arith.constant 0 : index
    %c0_0 = arith.constant 0 : index
    %c0_1 = arith.constant 0 : index
    %0 = vector.load %arg2[%c0, %c0_0, %c0_1] : memref<1x128x32xf32, #tpu.memory_space<vmem>>, vector<1x128x32xf32>
    %1 = vector.shape_cast %0 : vector<1x128x32xf32> to vector<128x32xf32>
    %c0_2 = arith.constant 0 : index
    %c0_3 = arith.constant 0 : index
    %c0_4 = arith.constant 0 : index
    %2 = vector.load %arg3[%c0_2, %c0_3, %c0_4] : memref<1x32x128xf32, #tpu.memory_space<vmem>>, vector<1x32x128xf32>
    %3 = vector.shape_cast %2 : vector<1x32x128xf32> to vector<32x128xf32>
    %c0_5 = arith.constant 0 : index
    %c0_6 = arith.constant 0 : index
    %c0_7 = arith.constant 0 : index
    %4 = vector.load %arg4[%c0_5, %c0_6, %c0_7] : memref<1x128x16xf32, #tpu.memory_space<vmem>>, vector<1x128x16xf32>
    %5 = vector.shape_cast %4 : vector<1x128x16xf32> to vector<128x16xf32>
    %c0_8 = arith.constant 0 : index
    %c0_9 = arith.constant 0 : index
    %c0_10 = arith.constant 0 : index
    %6 = vector.load %arg5[%c0_8, %c0_9, %c0_10] : memref<1x16x128xf32, #tpu.memory_space<vmem>>, vector<1x16x128xf32>
    %7 = vector.shape_cast %6 : vector<1x16x128xf32> to vector<16x128xf32>
    %8 = arith.mulf %1, %1 : vector<128x32xf32>
    %cst = arith.constant dense<0.000000e+00> : vector<128xf32>
    %9 = vector.multi_reduction <add>, %8, %cst [1] : vector<128x32xf32> to vector<128xf32>
    %10 = vector.shape_cast %9 : vector<128xf32> to vector<128x1xf32>
    %cst_11 = arith.constant 1.000000e-10 : f32
    %cst_12 = arith.constant 1.000000e-10 : f32
    %11 = arith.mulf %cst_11, %cst_12 : f32
    %12 = vector.broadcast %11 : f32 to vector<128x1xf32>
    %13 = arith.maximumf %10, %12 : vector<128x1xf32>
    %14 = math.rsqrt %13 : vector<128x1xf32>
    %15 = vector.broadcast %14 : vector<128x1xf32> to vector<128x32xf32>
    %16 = arith.mulf %1, %15 : vector<128x32xf32>
    %17 = arith.truncf %16 : vector<128x32xf32> to vector<128x32xbf16>
    %18 = arith.mulf %3, %3 : vector<32x128xf32>
    %cst_13 = arith.constant dense<0.000000e+00> : vector<128xf32>
    %19 = vector.multi_reduction <add>, %18, %cst_13 [0] : vector<32x128xf32> to vector<128xf32>
    %20 = vector.shape_cast %19 : vector<128xf32> to vector<1x128xf32>
    %cst_14 = arith.constant 1.000000e-10 : f32
    %cst_15 = arith.constant 1.000000e-10 : f32
    %21 = arith.mulf %cst_14, %cst_15 : f32
    %22 = vector.broadcast %21 : f32 to vector<1x128xf32>
    %23 = arith.maximumf %20, %22 : vector<1x128xf32>
    %24 = math.rsqrt %23 : vector<1x128xf32>
    %25 = vector.broadcast %24 : vector<1x128xf32> to vector<32x128xf32>
    %26 = arith.mulf %3, %25 : vector<32x128xf32>
    %27 = arith.truncf %26 : vector<32x128xf32> to vector<32x128xbf16>
    %28 = arith.mulf %5, %5 : vector<128x16xf32>
    %cst_16 = arith.constant dense<0.000000e+00> : vector<128xf32>
    %29 = vector.multi_reduction <add>, %28, %cst_16 [1] : vector<128x16xf32> to vector<128xf32>
    %30 = vector.shape_cast %29 : vector<128xf32> to vector<128x1xf32>
    %cst_17 = arith.constant 1.000000e-10 : f32
    %cst_18 = arith.constant 1.000000e-10 : f32
    %31 = arith.mulf %cst_17, %cst_18 : f32
    %32 = vector.broadcast %31 : f32 to vector<128x1xf32>
    %33 = arith.maximumf %30, %32 : vector<128x1xf32>
    %34 = math.rsqrt %33 : vector<128x1xf32>
    %35 = vector.broadcast %34 : vector<128x1xf32> to vector<128x16xf32>
    %36 = arith.mulf %5, %35 : vector<128x16xf32>
    %37 = arith.truncf %36 : vector<128x16xf32> to vector<128x16xbf16>
    %38 = arith.mulf %7, %7 : vector<16x128xf32>
    %cst_19 = arith.constant dense<0.000000e+00> : vector<128xf32>
    %39 = vector.multi_reduction <add>, %38, %cst_19 [0] : vector<16x128xf32> to vector<128xf32>
    %40 = vector.shape_cast %39 : vector<128xf32> to vector<1x128xf32>
    %cst_20 = arith.constant 1.000000e-10 : f32
    %cst_21 = arith.constant 1.000000e-10 : f32
    %41 = arith.mulf %cst_20, %cst_21 : f32
    %42 = vector.broadcast %41 : f32 to vector<1x128xf32>
    %43 = arith.maximumf %40, %42 : vector<1x128xf32>
    %44 = math.rsqrt %43 : vector<1x128xf32>
    %45 = vector.broadcast %44 : vector<1x128xf32> to vector<16x128xf32>
    %46 = arith.mulf %7, %45 : vector<16x128xf32>
    %47 = arith.truncf %46 : vector<16x128xf32> to vector<16x128xbf16>
    %cst_22 = arith.constant dense<0.000000e+00> : vector<128x128xf32>
    %48 = tpu.matmul %17, %27, %cst_22 {dimension_numbers = #tpu.dot_dimension_numbers<[1], [0], [0], [1], [0, 0, 1, 1], [], []>} : vector<128x32xbf16>, vector<32x128xbf16>, vector<128x128xf32> -> vector<128x128xf32>
    %cst_23 = arith.constant dense<0.000000e+00> : vector<128x128xf32>
    %49 = tpu.matmul %37, %47, %cst_23 {dimension_numbers = #tpu.dot_dimension_numbers<[1], [0], [0], [1], [0, 0, 1, 1], [], []>} : vector<128x16xbf16>, vector<16x128xbf16>, vector<128x128xf32> -> vector<128x128xf32>
    %cst_24 = arith.constant 0.000000e+00 : f32
    %50 = vector.broadcast %cst_24 : f32 to vector<128x128xf32>
    %51 = arith.maximumf %49, %50 : vector<128x128xf32>
    %cst_25 = arith.constant 0.000000e+00 : f32
    %52 = vector.broadcast %cst_25 : f32 to vector<128x128xf32>
    %53 = arith.subf %52, %51 : vector<128x128xf32>
    %cst_26 = arith.constant dense<0.000000e+00> : vector<128xf32>
    %54 = vector.multi_reduction <add>, %48, %cst_26 [1] : vector<128x128xf32> to vector<128xf32>
    %55 = vector.shape_cast %54 : vector<128xf32> to vector<128x1xf32>
    %cst_27 = arith.constant dense<0.000000e+00> : vector<128xf32>
    %56 = vector.multi_reduction <add>, %53, %cst_27 [1] : vector<128x128xf32> to vector<128xf32>
    %57 = vector.shape_cast %56 : vector<128xf32> to vector<128x1xf32>
    %cst_28 = arith.constant 1.562500e-02 : f32
    %58 = vector.broadcast %cst_28 : f32 to vector<128x1xf32>
    %59 = arith.mulf %55, %58 : vector<128x1xf32>
    %60 = vector.shape_cast %55 : vector<128x1xf32> to vector<1x128x1xf32>
    %cst_29 = arith.constant dense<0.000000e+00> : vector<1xf32>
    %61 = vector.multi_reduction <add>, %60, %cst_29 [1, 2] : vector<1x128x1xf32> to vector<1xf32>
    %62 = vector.shape_cast %61 : vector<1xf32> to vector<1x1x1xf32>
    %63 = vector.extract %62[0, 0, 0] : f32 from vector<1x1x1xf32>
    %64 = vector.shape_cast %57 : vector<128x1xf32> to vector<1x128x1xf32>
    %cst_30 = arith.constant dense<0.000000e+00> : vector<1xf32>
    %65 = vector.multi_reduction <add>, %64, %cst_30 [1, 2] : vector<1x128x1xf32> to vector<1xf32>
    %66 = vector.shape_cast %65 : vector<1xf32> to vector<1x1x1xf32>
    %67 = vector.extract %66[0, 0, 0] : f32 from vector<1x1x1xf32>
    %68 = arith.mulf %53, %48 : vector<128x128xf32>
    %69 = vector.shape_cast %68 : vector<128x128xf32> to vector<1x128x128xf32>
    %cst_31 = arith.constant dense<0.000000e+00> : vector<1xf32>
    %70 = vector.multi_reduction <add>, %69, %cst_31 [1, 2] : vector<1x128x128xf32> to vector<1xf32>
    %71 = vector.shape_cast %70 : vector<1xf32> to vector<1x1x1xf32>
    %72 = vector.extract %71[0, 0, 0] : f32 from vector<1x1x1xf32>
    %73 = arith.mulf %59, %57 : vector<128x1xf32>
    %74 = vector.shape_cast %73 : vector<128x1xf32> to vector<1x128x1xf32>
    %cst_32 = arith.constant dense<0.000000e+00> : vector<1xf32>
    %75 = vector.multi_reduction <add>, %74, %cst_32 [1, 2] : vector<1x128x1xf32> to vector<1xf32>
    %76 = vector.shape_cast %75 : vector<1xf32> to vector<1x1x1xf32>
    %77 = vector.extract %76[0, 0, 0] : f32 from vector<1x1x1xf32>
    %78 = arith.subf %72, %77 : f32
    %79 = tpu.iota {dimensions = array<i32: 0>} : vector<8x128xi32>
    %c0_i32 = arith.constant 0 : i32
    %80 = vector.broadcast %c0_i32 : i32 to vector<8x128xi32>
    %81 = arith.cmpi eq, %79, %80 : vector<8x128xi32>
    %cst_33 = arith.constant 0.000000e+00 : f32
    %82 = vector.broadcast %63 : f32 to vector<8x128xf32>
    %83 = vector.broadcast %cst_33 : f32 to vector<8x128xf32>
    %84 = arith.select %81, %82, %83 : vector<8x128xi1>, vector<8x128xf32>
    %c1_i32 = arith.constant 1 : i32
    %85 = vector.broadcast %c1_i32 : i32 to vector<8x128xi32>
    %86 = arith.cmpi eq, %79, %85 : vector<8x128xi32>
    %cst_34 = arith.constant 0.000000e+00 : f32
    %87 = vector.broadcast %78 : f32 to vector<8x128xf32>
    %88 = vector.broadcast %cst_34 : f32 to vector<8x128xf32>
    %89 = arith.select %86, %87, %88 : vector<8x128xi1>, vector<8x128xf32>
    %90 = arith.addf %84, %89 : vector<8x128xf32>
    %c2_i32 = arith.constant 2 : i32
    %91 = vector.broadcast %c2_i32 : i32 to vector<8x128xi32>
    %92 = arith.cmpi eq, %79, %91 : vector<8x128xi32>
    %cst_35 = arith.constant 0.000000e+00 : f32
    %93 = vector.broadcast %67 : f32 to vector<8x128xf32>
    %94 = vector.broadcast %cst_35 : f32 to vector<8x128xf32>
    %95 = arith.select %92, %93, %94 : vector<8x128xi1>, vector<8x128xf32>
    %96 = arith.addf %90, %95 : vector<8x128xf32>
    %c0_36 = arith.constant 0 : index
    %c0_37 = arith.constant 0 : index
    %c0_38 = arith.constant 0 : index
    %c0_39 = arith.constant 0 : index
    %97 = vector.load %arg6[%c0_36, %c0_37, %c0_38, %c0_39] : memref<1x1x8x128xf32, #tpu.memory_space<vmem>>, vector<1x1x8x128xf32>
    %98 = vector.shape_cast %97 : vector<1x1x8x128xf32> to vector<8x128xf32>
    %99 = vector.shape_cast %96 : vector<8x128xf32> to vector<1x1x8x128xf32>
    tpu.vector_store %arg6[%c0_36, %c0_37, %c0_38, %c0_39], %99 {strides = array<i32>} : memref<1x1x8x128xf32, #tpu.memory_space<vmem>>, vector<1x1x8x128xf32>,
    return
  }
  func.func @transform_0(%arg0: i32, %arg1: i32) -> (i32, i32, i32) {
    %c0_i32 = arith.constant 0 : i32
    %c0_i32_0 = arith.constant 0 : i32
    return %arg0, %arg1, %c0_i32 : i32, i32, i32
  }
  func.func @transform_1(%arg0: i32, %arg1: i32) -> (i32, i32, i32) {
    %c0_i32 = arith.constant 0 : i32
    %c0_i32_0 = arith.constant 0 : i32
    %c0_i32_1 = arith.constant 0 : i32
    return %arg0, %c0_i32, %c0_i32_0 : i32, i32, i32
  }
  func.func @transform_2(%arg0: i32, %arg1: i32) -> (i32, i32, i32) {
    %c0_i32 = arith.constant 0 : i32
    %c0_i32_0 = arith.constant 0 : i32
    return %arg0, %arg1, %c0_i32 : i32, i32, i32
  }
  func.func @transform_3(%arg0: i32, %arg1: i32) -> (i32, i32, i32) {
    %c0_i32 = arith.constant 0 : i32
    %c0_i32_0 = arith.constant 0 : i32
    %c0_i32_1 = arith.constant 0 : i32
    return %arg0, %c0_i32, %c0_i32_0 : i32, i32, i32
  }
  func.func @transform_4(%arg0: i32, %arg1: i32) -> (i32, i32, i32, i32) {
    %c0_i32 = arith.constant 0 : i32
    %c0_i32_0 = arith.constant 0 : i32
    %c0_i32_1 = arith.constant 0 : i32
    return %arg0, %arg1, %c0_i32, %c0_i32_0 : i32, i32, i32, i32
  }
}

</mosaic_0001>

<bundles_post_ra>
// kernel: contrastive_correlation_loss.3
= control target key start
LH: loop header
LB: loop body
LE: loop exit
PB: predicated region body
PF: predicated region fallthrough
CT: control target
= control target key end

     0   :  { %s1700_s15 = smov 0   ;;  %s1702_s16 = smov 0   ;;  %s2717_s0 = inlined_call_operand.vmem [shape: f32[2,128,32], index: 0, kind: input, shape index: {}]   ;;  %s2718_s1 = inlined_call_operand.vmem [shape: f32[2,32,128], index: 1, kind: input, shape index: {}]   ;;  %s2719_s2 = inlined_call_operand.vmem [shape: f32[2,128,16], index: 2, kind: input, shape index: {}]   ;;  %s2720_s3 = inlined_call_operand.vmem [shape: f32[2,16,128], index: 3, kind: input, shape index: {}]   ;;  %s2721_s4 = inlined_call_operand.vmem [shape: f32[2,1,8,128], index: 4, kind: output, shape index: {}]  }
   0x1   :  { %s1704_s17 = smov 0  }
   0x2 LB: > { %s26_s18 = sadd.s32 1, %s1669_s16  ;;  %p1503_p0 = scmp.ge.s32.totalorder %s1673_s17, 1  ;;  %s1673_s17 = sphi %s1704_s17, %s14_s17   ;;  %s1669_s16 = sphi %s1702_s16, %s2790_s16   ;;  %s1665_s15 = sphi %s1700_s15, %s2789_s15  }
   0x3   : > { %p28_p1 = scmp.ge.s32.totalorder %s26_s18, 2  ;;  %p220_p2 = scmp.lt.s32.totalorder %s1673_s17, 3 }
   0x5   : > { %s2792_s18 = smov (%p28_p1, %s26_s18), 0  ;;  %p221_p3 = pnand %p1503_p0, %p220_p2 }
   0x6   : > { %p272_p4 = scmp.lt.s32.totalorder (!%p221_p3), %s1665_s15, 1 }
   0x7   : > { %224 = sbr.rel (%p221_p3) target bundleno = 716 (0x2cc), region = 36 }
   0xc   : > { %s2794_s15 = smov (!%p272_p4, %s1665_s15), 1  ;;  %vm2723_vm0 = vcmask 130048   ;;  %vm2722_vm1 = vcmask 261120  }
   0xd   : > { %s1531_s19 = sshll.u32 %s2794_s15, 7  ;;  %s1532_s26 = sshll.u32 %s2794_s15, 5 }
   0xe   : > { %s1724_s22 = scalar_lea.vmem %s2719_s2, %s1531_s19  ;;  %s1729_s25 = scalar_lea.vmem %s2717_s0, %s1531_s19 }
   0xf   : > { %v1732_v0 = vld [vmem:[%s1724_s22 + $0x10] sm:$0xff]  ;;  %v1735_v1 = vld [vmem:[%s1724_s22] sm:$0xff]  ;;  %v1747_v6 = vld [vmem:[%s1724_s22 + $0x18] sm:$0xff]  ;;  %s285_s29 = scalar_lea.vmem %s2718_s1, %s1532_s26  ;;  %s1534_s30 = sshll.u32 %s2794_s15, 4 }
  0x10   : > { %v1738_v2 = vld [vmem:[%s1729_s25] sm:$0xff]  ;;  %v644_v3 = vmul.f32 %v1732_v0, %v1732_v0  ;;  %v642_v4 = vmul.f32 %v1735_v1, %v1735_v1  ;;  %v1750_v7 = vld [vmem:[%s1724_s22 + $0x8] sm:$0xff]  ;;  %v645_v12 = vmul.f32 %v1747_v6, %v1747_v6  ;;  %v1771_v19 = vld [vmem:[%s1729_s25 + $0x10] sm:$0xff]  ;;  %s300_s7 = scalar_lea.vmem %s2720_s3, %s1534_s30  ;;  %s1512_s13 = sshll.u32 %s2794_s15, 3 }
  0x11   : > { %v347_v5 = vmul.f32 %v1738_v2, %v1738_v2  ;;  %v1756_v11 = vld [vmem:[%s1729_s25 + $0x8] sm:$0xff]  ;;  %v643_v13 = vmul.f32 %v1750_v7, %v1750_v7  ;;  %v1768_v18 = vld [vmem:[%s1729_s25 + $0x40] sm:$0xff]  ;;  %v349_v22 = vmul.f32 %v1771_v19, %v1771_v19  ;;  %v1786_v27 = vld [vmem:[%s1729_s25 + $0x18] sm:$0xff]  ;;  %s307_s20 = scalar_lea.vmem %s2721_s4, %s1512_s13 }
  0x12   : > { %v665_v8 = vsel %vm2723_vm0, %v644_v3, 0.0  ;;  %v659_v9 = vsel %vm2723_vm0, %v642_v4, 0.0  ;;  %v348_v14 = vmul.f32 %v1756_v11, %v1756_v11  ;;  %v668_v15 = vsel %vm2723_vm0, %v645_v12, 0.0  ;;  %v1774_v20 = vld [vmem:[%s1729_s25 + $0x48] sm:$0xff]  ;;  %v1792_v29 = vld [vmem:[%s1724_s22 + $0x20] sm:$0xff]  ;;  %v1804_v36 = vld [vmem:[%s1724_s22 + $0x50] sm:$0xff] }
  0x13   : > { %v364_v10 = vsel %vm2722_vm1, %v347_v5, 0.0  ;;  %666 = vadd.xlane.f32.xlu2 %v665_v8  ;;  %660 = vadd.xlane.f32.xlu0 %v659_v9  ;;  %v662_v16 = vsel %vm2723_vm0, %v643_v13, 0.0  ;;  %v355_v21 = vmul.f32 %v1768_v18, %v1768_v18  ;;  %v356_v23 = vmul.f32 %v1774_v20, %v1774_v20  ;;  %v1789_v28 = vld [vmem:[%s1724_s22 + $0x28] sm:$0xff]  ;;  %v1807_v37 = vld [vmem:[%s1729_s25 + $0x50] sm:$0xff]  ;;  %v1810_v38 = vld [vmem:[%s1724_s22 + $0x58] sm:$0xff] }
  0x14   : > { %365 = vadd.xlane.f32.xlu1 %v364_v10  ;;  %v367_v17 = vsel %vm2722_vm1, %v348_v14, 0.0  ;;  %v370_v25 = vsel %vm2722_vm1, %v349_v22, 0.0  ;;  %v350_v30 = vmul.f32 %v1786_v27, %v1786_v27  ;;  %v647_v31 = vmul.f32 %v1789_v28, %v1789_v28  ;;  %v1822_v45 = vld [vmem:[%s1729_s25 + $0x58] sm:$0xff]  ;;  %v1825_v46 = vld [vmem:[%s1729_s25 + $0x28] sm:$0xff]  ;;  %v1828_v47 = vld [vmem:[%s1729_s25 + $0x20] sm:$0xff] }
  0x15   : > { %v388_v24 = vsel %vm2722_vm1, %v355_v21, 0.0  ;;  %v391_v26 = vsel %vm2722_vm1, %v356_v23, 0.0  ;;  %v646_v32 = vmul.f32 %v1792_v29, %v1792_v29  ;;  %v652_v39 = vmul.f32 %v1804_v36, %v1804_v36  ;;  %v335_v54 = vld [vmem:[%s1724_s22 + $0x30] sm:$0xff]  ;;  %v341_v55 = vld [vmem:[%s1724_s22 + $0x60] sm:$0xff]  ;;  %v336_v56 = vld [vmem:[%s1724_s22 + $0x38] sm:$0xff] }
  0x16   : > { %v373_v33 = vsel %vm2722_vm1, %v350_v30, 0.0  ;;  %v674_v34 = vsel %vm2723_vm0, %v647_v31, 0.0  ;;  %v357_v40 = vmul.f32 %v1807_v37, %v1807_v37  ;;  %v653_v41 = vmul.f32 %v1810_v38, %v1810_v38  ;;  %v342_v63 = vld [vmem:[%s1724_s22 + $0x68] sm:$0xff]  ;;  %v1848_v4 = vld [vmem:[%s1729_s25 + $0x60] sm:$0xff]  ;;  %v315_v14 = vld [vmem:[%s1729_s25 + $0x30] sm:$0xff] }
  0x17   : > { %v671_v35 = vsel %vm2723_vm0, %v646_v32, 0.0  ;;  %v689_v42 = vsel %vm2723_vm0, %v652_v39, 0.0  ;;  %v358_v48 = vmul.f32 %v1822_v45, %v1822_v45  ;;  %v352_v49 = vmul.f32 %v1825_v46, %v1825_v46  ;;  %v322_v3 = vld [vmem:[%s1729_s25 + $0x68] sm:$0xff]  ;;  %v344_v30 = vld [vmem:[%s1724_s22 + $0x78] sm:$0xff]  ;;  %v343_v31 = vld [vmem:[%s1724_s22 + $0x70] sm:$0xff] }
  0x18   : > { %v394_v43 = vsel %vm2722_vm1, %v357_v40, 0.0  ;;  %v692_v44 = vsel %vm2723_vm0, %v653_v41, 0.0  ;;  %v351_v50 = vmul.f32 %v1828_v47, %v1828_v47  ;;  %v648_v57 = vmul.f32 %v335_v54, %v335_v54  ;;  %v1870_v40 = vld [vmem:[%s285_s29] sm:$0xff]  ;;  %v1872_v41 = vld [vmem:[%s285_s29 + $0x8] sm:$0xff]  ;;  %v328_v54 = vld [vmem:[%s285_s29 + $0x18] sm:$0xff] }
  0x19   : > { %v397_v51 = vsel %vm2722_vm1, %v358_v48, 0.0  ;;  %v379_v52 = vsel %vm2722_vm1, %v352_v49, 0.0  ;;  %v654_v58 = vmul.f32 %v341_v55, %v341_v55  ;;  %v649_v59 = vmul.f32 %v336_v56, %v336_v56  ;;  %v324_v49 = vld [vmem:[%s1729_s25 + $0x78] sm:$0xff] }
  0x1a   : > { %v376_v53 = vsel %vm2722_vm1, %v351_v50, 0.0  ;;  %v677_v60 = vsel %vm2723_vm0, %v648_v57, 0.0  ;;  %v655_v5 = vmul.f32 %v342_v63, %v342_v63  ;;  %v360_v8 = vmul.f32 %v322_v3, %v322_v3  ;;  %v327_v50 = vld [vmem:[%s285_s29 + $0x10] sm:$0xff] }
  0x1b   : > { %669 = vadd.xlane.f32.xlu2 %v668_v15  ;;  %663 = vadd.xlane.f32.xlu0 %v662_v16  ;;  %v695_v61 = vsel %vm2723_vm0, %v654_v58, 0.0  ;;  %v680_v62 = vsel %vm2723_vm0, %v649_v59, 0.0  ;;  %v359_v9 = vmul.f32 %v1848_v4, %v1848_v4  ;;  %v337_v15 = vld [vmem:[%s1724_s22 + $0x40] sm:$0xff]  ;;  %v316_v16 = vld [vmem:[%s1729_s25 + $0x38] sm:$0xff]  ;;  %v613_v48 = vmul.f32 %v1872_v41, %v1872_v41 }
  0x1c   : > { %368 = vadd.xlane.f32.xlu1 %v367_v17  ;;  %v698_v10 = vsel %vm2723_vm0, %v655_v5, 0.0  ;;  %v403_v12 = vsel %vm2722_vm1, %v360_v8, 0.0  ;;  %v353_v17 = vmul.f32 %v315_v14, %v315_v14  ;;  %v650_v21 = vmul.f32 %v337_v15, %v337_v15 }
  0x1d   : > { %v400_v13 = vsel %vm2722_vm1, %v359_v9, 0.0  ;;  %v354_v22 = vmul.f32 %v316_v16, %v316_v16  ;;  %v362_v55 = vmul.f32 %v324_v49, %v324_v49  ;;  %v615_v56 = vmul.f32 %v328_v54, %v328_v54 }
  0x1e   : > { %v382_v23 = vsel %vm2722_vm1, %v353_v17, 0.0 }
  0x23   : > { %389 = vadd.xlane.f32.xlu0 %v388_v24  ;;  %371 = vadd.xlane.f32.xlu2 %v370_v25  ;;  %v683_v24 = vsel %vm2723_vm0, %v650_v21, 0.0  ;;  %v385_v25 = vsel %vm2722_vm1, %v354_v22, 0.0 }
  0x24   : > { %392 = vadd.xlane.f32.xlu1 %v391_v26  ;;  %v338_v26 = vld [vmem:[%s1724_s22 + $0x48] sm:$0xff] }
  0x25   : > { %v651_v32 = vmul.f32 %v338_v26, %v338_v26 }
  0x2b   : > { %374 = vadd.xlane.f32.xlu0 %v373_v33  ;;  %675 = vadd.xlane.f32.xlu2 %v674_v34  ;;  %v657_v33 = vmul.f32 %v344_v30, %v344_v30  ;;  %v656_v34 = vmul.f32 %v343_v31, %v343_v31 }
  0x2c   : > { %672 = vadd.xlane.f32.xlu1 %v671_v35  ;;  %v686_v35 = vsel %vm2723_vm0, %v651_v32, 0.0 }
  0x2d   : > { %v704_v39 = vsel %vm2723_vm0, %v657_v33, 0.0 }
  0x33   : > { %690 = vadd.xlane.f32.xlu0 %v689_v42  ;;  %395 = vadd.xlane.f32.xlu2 %v394_v43  ;;  %v701_v42 = vsel %vm2723_vm0, %v656_v34, 0.0  ;;  %v323_v43 = vld [vmem:[%s1729_s25 + $0x70] sm:$0xff] }
  0x34   : > { %693 = vadd.xlane.f32.xlu1 %v692_v44  ;;  %v612_v44 = vmul.f32 %v1870_v40, %v1870_v40 }
  0x3b   : > { %398 = vadd.xlane.f32.xlu0 %v397_v51  ;;  %380 = vadd.xlane.f32.xlu2 %v379_v52  ;;  %v614_v51 = vmul.f32 %v327_v50, %v327_v50  ;;  %v616_v52 = vadd.f32 %v613_v48, %v612_v44 }
  0x3c   : > { %377 = vadd.xlane.f32.xlu1 %v376_v53  ;;  %v361_v53 = vmul.f32 %v323_v43, %v323_v43 }
  0x3d   : > { %v617_v57 = vadd.f32 %v616_v52, %v614_v51 }
  0x3e   : > { %v406_v59 = vsel %vm2722_vm1, %v361_v53, 0.0 }
  0x3f   : > { %v618_v58 = vadd.f32 %v617_v57, %v615_v56 }
  0x41   : > { %v619_v63 = vrot.slane %v618_v58, 4 }
  0x43   : > { %678 = vadd.xlane.f32.xlu0 %v677_v60  ;;  %696 = vadd.xlane.f32.xlu2 %v695_v61  ;;  %v345_v60 = vld [vmem:[%s300_s7] sm:$0xff]  ;;  %v346_v61 = vld [vmem:[%s300_s7 + $0x8] sm:$0xff]  ;;  %v620_v8 = vadd.f32 %v619_v63, %v618_v58 }
  0x44   : > { %681 = vadd.xlane.f32.xlu1 %v680_v62  ;;  %v409_v62 = vsel %vm2722_vm1, %v362_v55, 0.0  ;;  %v907_v3 = vmul.f32 %v345_v60, %v345_v60  ;;  %v908_v5 = vmul.f32 %v346_v61, %v346_v61 }
  0x46   : > { %v909_v9 = vadd.f32 %v908_v5, %v907_v3 }
  0x4b   : > { %699 = vadd.xlane.f32.xlu0 %v698_v10  ;;  %404 = vadd.xlane.f32.xlu2 %v403_v12  ;;  %v621_v10 = vrot.slane %v620_v8, 2  ;;  %v910_v12 = vrot.slane %v909_v9, 4 }
  0x4c   : > { %401 = vadd.xlane.f32.xlu1 %v400_v13 }
  0x4d   : > { %v622_v13 = vadd.f32 %v621_v10, %v620_v8  ;;  %v911_v14 = vadd.f32 %v910_v12, %v909_v9 }
  0x4f   : > { %v623_v15 = vrot.slane %v622_v13, 1  ;;  %v912_v16 = vrot.slane %v911_v14, 2 }
  0x51   : > { %v624_v17 = vadd.f32 %v623_v15, %v622_v13  ;;  %v913_v21 = vadd.f32 %v912_v16, %v911_v14 }
  0x53   : > { %383 = vadd.xlane.f32.xlu0 %v382_v23  ;;  %684 = vadd.xlane.f32.xlu2 %v683_v24  ;;  %v625_v22 = vmax.f32 %v624_v17, 1.00000005e-20  ;;  %v914_v23 = vrot.slane %v913_v21, 1 }
  0x54   : > { %386 = vadd.xlane.f32.xlu1 %v385_v25 }
  0x55   : > { %1570 = vrsqrt.f32 %v625_v22  ;;  %v915_v24 = vadd.f32 %v914_v23, %v913_v21  ;;  %vm632_vm2 = vweird.f32 %v625_v22 }
  0x57   : > { %v916_v25 = vmax.f32 %v915_v24, 1.00000005e-20 }
  0x59   : > { %1572 = vrsqrt.f32 %v916_v25  ;;  %vm923_vm5 = vweird.f32 %v916_v25 }
  0x5b   : > { %687 = vadd.xlane.f32.xlu0 %v686_v35  ;;  %705 = vadd.xlane.f32.xlu2 %v704_v39  ;;  %v1571_v26 = vpop.eup %1570 }
  0x5c   : > { %702 = vadd.xlane.f32.xlu1 %v701_v42  ;;  %v627_v30 = vmul.f32 %v1571_v26, %v625_v22  ;;  %vm633_vm3 = vweird.f32 %v1571_v26 }
  0x5d   : > { %vm634_vm4 = vmor %vm632_vm2, %vm633_vm3 }
  0x5e   : > { %v628_v31 = vmul.f32 %v1571_v26, %v627_v30 }
  0x5f   : > { %v1573_v32 = vpop.eup %1572 }
  0x60   : > { %v629_v33 = vmul.f32 0.5, %v628_v31  ;;  %v918_v34 = vmul.f32 %v1573_v32, %v916_v25  ;;  %vm924_vm6 = vweird.f32 %v1573_v32 }
  0x61   : > { %vm925_vm7 = vmor %vm923_vm5, %vm924_vm6 }
  0x62   : > { %v630_v35 = vsub.f32 1.5, %v629_v33  ;;  %v919_v39 = vmul.f32 %v1573_v32, %v918_v34 }
  0x63   : > { %407 = vadd.xlane.f32.xlu0 %v406_v59 }
  0x64   : > { %410 = vadd.xlane.f32.xlu1 %v409_v62  ;;  %v631_v42 = vmul.f32 %v1571_v26, %v630_v35  ;;  %v920_v43 = vmul.f32 0.5, %v919_v39 }
  0x66   : > { %v635_v44 = vsel %vm634_vm4, %v1571_v26, %v631_v42  ;;  %v921_v48 = vsub.f32 1.5, %v920_v43 }
  0x67   : > { %v638_v49 = vmul.f32 %v635_v44, %v327_v50  ;;  %v639_v51 = vmul.f32 %v635_v44, %v328_v54  ;;  %v636_v56 = vmul.f32 %v635_v44, %v1870_v40  ;;  %v637_v57 = vmul.f32 %v635_v44, %v1872_v41 }
  0x68   : > { %v922_v52 = vmul.f32 %v1573_v32, %v921_v48 }
  0x69   : > { %v641_v53 = vpack.c.bf16 %v639_v51, %v638_v49  ;;  %v640_v54 = vpack.c.bf16 %v637_v57, %v636_v56 }
  0x6a   : > { %v926_v55 = vsel %vm925_vm7, %v1573_v32, %v922_v52 }
  0x6b   : > { %960 = vmatpush.bf16.msra.mxu0 %v641_v53  ;;  %v927_v58 = vmul.f32 %v926_v55, %v345_v60  ;;  %v928_v59 = vmul.f32 %v926_v55, %v346_v61  ;;  %1535 = vmatpush.bf16.msra.mxu2 %v641_v53 }
  0x6d   : > { %v929_v5 = vpack.c.bf16 %v928_v59, %v927_v58 }
  0x6f   : > { %961 = vmatpush.bf16.msra.mxu0 %v640_v54  ;;  %1034 = vmatpush.bf16.msra.mxu1 %v929_v5 }
  0x70   : > { %1536 = vmatpush.bf16.msra.mxu2 %v640_v54  ;;  %1537 = vmatpush.bf16.msra.mxu3 %v929_v5 }
  0x86   : > { %v667_v62 = vpop.xlane.xlu2 %666  ;;  %v661_v63 = vpop.xlane.xlu0 %660 }
  0x87   : > { %v1889_v3 = vmax.f32 %v661_v63, 1.00000005e-20  ;;  %v366_v50 = vpop.xlane.xlu1 %365  ;;  %v1895_v40 = vmax.f32 %v667_v62, 1.00000005e-20 }
  0x88   : > { %v1891_v8 = vmax.f32 %v366_v50, 1.00000005e-20 }
  0x89   : > { %1574 = vrsqrt.f32 %v1889_v3  ;;  %vm729_vm8 = vweird.f32 %v1889_v3  ;;  %vm749_vm6 = vweird.f32 %v1895_v40 }
  0x8a   : > { %1576 = vrsqrt.f32 %v1891_v8  ;;  %vm434_vm3 = vweird.f32 %v1891_v8 }
  0x8b   : > { %1578 = vrsqrt.f32 %v1895_v40 }
  0x8e   : > { %v670_v41 = vpop.xlane.xlu2 %669  ;;  %v664_v60 = vpop.xlane.xlu0 %663 }
  0x8f   : > { %v708_v61 = vmax.f32 %v664_v60, 1.00000005e-20  ;;  %v369_v9 = vpop.xlane.xlu1 %368  ;;  %v1897_v10 = vpop.eup %1574  ;;  %v1908_v16 = vmax.f32 %v670_v41, 1.00000005e-20 }
  0x90   : > { %v1899_v12 = vmax.f32 %v369_v9, 1.00000005e-20  ;;  %v1901_v13 = vpop.eup %1576  ;;  %v724_v14 = vmul.f32 %v1897_v10, %v1889_v3  ;;  %vm730_vm9 = vweird.f32 %v1897_v10 }
  0x91   : > { %v429_v15 = vmul.f32 %v1901_v13, %v1891_v8  ;;  %1580 = vrsqrt.f32 %v708_v61  ;;  %v1914_v25 = vpop.eup %1578  ;;  %vm435_vm10 = vweird.f32 %v1901_v13  ;;  %vm1949_vm12 = vmor %vm729_vm8, %vm730_vm9  ;;  %vm739_vm13 = vweird.f32 %v708_v61 }
  0x92   : > { %v725_v17 = vmul.f32 %v1897_v10, %v724_v14  ;;  %1582 = vrsqrt.f32 %v1899_v12  ;;  %v744_v42 = vmul.f32 %v1914_v25, %v1895_v40  ;;  %vm444_vm2 = vweird.f32 %v1899_v12  ;;  %vm1980_vm5 = vmor %vm434_vm3, %vm435_vm10 }
  0x93   : > { %v430_v22 = vmul.f32 %v1901_v13, %v429_v15  ;;  %1584 = vrsqrt.f32 %v1908_v16  ;;  %vm750_vm7 = vweird.f32 %v1914_v25  ;;  %vm759_vm8 = vweird.f32 %v1908_v16 }
  0x94   : > { %v726_v21 = vmul.f32 0.5, %v725_v17  ;;  %v745_v56 = vmul.f32 %v1914_v25, %v744_v42 }
  0x95   : > { %v431_v35 = vmul.f32 0.5, %v430_v22 }
  0x96   : > { %v390_v23 = vpop.xlane.xlu0 %389  ;;  %v372_v24 = vpop.xlane.xlu2 %371  ;;  %v727_v34 = vsub.f32 1.5, %v726_v21 }
  0x97   : > { %v1916_v26 = vmax.f32 %v390_v23, 1.00000005e-20  ;;  %v1918_v30 = vmax.f32 %v372_v24, 1.00000005e-20  ;;  %v393_v31 = vpop.xlane.xlu1 %392  ;;  %v1581_v32 = vpop.eup %1580  ;;  %v432_v53 = vsub.f32 1.5, %v431_v35  ;;  %v746_v23 = vmul.f32 0.5, %v745_v56 }
  0x98   : > { %v1920_v33 = vpop.eup %1582  ;;  %v734_v39 = vmul.f32 %v1581_v32, %v708_v61  ;;  %v1932_v51 = vmax.f32 %v393_v31, 1.00000005e-20  ;;  %v728_v52 = vmul.f32 %v1897_v10, %v727_v34  ;;  %vm740_vm11 = vweird.f32 %v1581_v32 }
  0x99   : > { %1586 = vrsqrt.f32 %v1916_v26  ;;  %v439_v43 = vmul.f32 %v1920_v33, %v1899_v12  ;;  %v1928_v48 = vpop.eup %1584  ;;  %vm445_vm14 = vweird.f32 %v1920_v33  ;;  %v433_v15 = vmul.f32 %v1901_v13, %v432_v53  ;;  %vm741_vm15 = vmor %vm739_vm13, %vm740_vm11 }
  0x9a   : > { %v735_v44 = vmul.f32 %v1581_v32, %v734_v39  ;;  %1588 = vrsqrt.f32 %v1918_v30  ;;  %v754_v63 = vmul.f32 %v1928_v48, %v1908_v16  ;;  %v732_v3 = vsel %vm1949_vm12, %v1897_v10, %v728_v52  ;;  %vm1972_vm4 = vmor %vm444_vm2, %vm445_vm14 }
  0x9b   : > { %v440_v49 = vmul.f32 %v1920_v33, %v439_v43  ;;  %1590 = vrsqrt.f32 %v1932_v51  ;;  %v883_v39 = vmul.f32 %v732_v3, %v1735_v1  ;;  %v437_v43 = vsel %vm1980_vm5, %v1901_v13, %v433_v15 }
  0x9c   : > { %v736_v55 = vmul.f32 0.5, %v735_v44  ;;  %v755_v24 = vmul.f32 %v1928_v48, %v754_v63  ;;  %v588_v41 = vmul.f32 %v437_v43, %v1738_v2  ;;  %vm514_vm10 = vweird.f32 %v1916_v26 }
  0x9d   : > { %v441_v57 = vmul.f32 0.5, %v440_v49  ;;  %vm524_vm13 = vweird.f32 %v1932_v51  ;;  %vm760_vm14 = vweird.f32 %v1928_v48  ;;  %vm454_vm2 = vweird.f32 %v1918_v30 }
  0x9e   : > { %v375_v58 = vpop.xlane.xlu0 %374  ;;  %v676_v59 = vpop.xlane.xlu2 %675  ;;  %v737_v50 = vsub.f32 1.5, %v736_v55  ;;  %v756_v63 = vmul.f32 0.5, %v755_v24 }
  0x9f   : > { %v1939_v62 = vpop.eup %1586  ;;  %v1943_v54 = vmax.f32 %v375_v58, 1.00000005e-20  ;;  %v673_v5 = vpop.xlane.xlu1 %672  ;;  %v442_v60 = vsub.f32 1.5, %v441_v57  ;;  %v1995_v52 = vmax.f32 %v676_v59, 1.00000005e-20  ;;  %v747_v58 = vsub.f32 1.5, %v746_v23 }
  0xa0   : > { %v509_v9 = vmul.f32 %v1939_v62, %v1916_v26  ;;  %v1956_v14 = vpop.eup %1588  ;;  %v738_v17 = vmul.f32 %v1581_v32, %v737_v50  ;;  %vm515_vm9 = vweird.f32 %v1939_v62  ;;  %v757_v23 = vsub.f32 1.5, %v756_v63 }
  0xa1   : > { %1592 = vrsqrt.f32 %v1943_v54  ;;  %v443_v61 = vmul.f32 %v1920_v33, %v442_v60  ;;  %v449_v22 = vmul.f32 %v1956_v14, %v1918_v30  ;;  %v1976_v34 = vpop.eup %1590  ;;  %v2024_v2 = vmul.f32 %v1914_v25, %v747_v58  ;;  %vm2028_vm12 = vmor %vm514_vm10, %vm515_vm9 }
  0xa2   : > { %v510_v21 = vmul.f32 %v1939_v62, %v509_v9  ;;  %v742_v10 = vsel %vm741_vm15, %v1581_v32, %v738_v17  ;;  %v519_v32 = vmul.f32 %v1976_v34, %v1932_v51  ;;  %v2015_v17 = vmax.f32 %v673_v5, 1.00000005e-20  ;;  %vm2086_vm9 = vmor %vm759_vm8, %vm760_vm14 }
  0xa3   : > { %v447_v8 = vsel %vm1972_vm4, %v1920_v33, %v443_v61  ;;  %v884_v42 = vmul.f32 %v742_v10, %v1750_v7  ;;  %v450_v49 = vmul.f32 %v1956_v14, %v449_v22  ;;  %vm525_vm11 = vweird.f32 %v1976_v34  ;;  %vm2072_vm4 = vmor %vm749_vm6, %vm750_vm7 }
  0xa4   : > { %v511_v35 = vmul.f32 0.5, %v510_v21  ;;  %v520_v1 = vmul.f32 %v1976_v34, %v519_v32  ;;  %v589_v13 = vmul.f32 %v447_v8, %v1756_v11  ;;  %vm2044_vm15 = vmor %vm524_vm13, %vm525_vm11  ;;  %vm455_vm3 = vweird.f32 %v1956_v14 }
  0xa5   : > { %v899_v56 = vpack.c.bf16 %v884_v42, %v883_v39  ;;  %v451_v9 = vmul.f32 0.5, %v450_v49  ;;  %v2063_v49 = vmul.f32 %v1928_v48, %v757_v23  ;;  %vm2098_vm6 = vmor %vm454_vm2, %vm455_vm3  ;;  %vm464_vm7 = vweird.f32 %v1943_v54 }
  0xa6   : > { %v512_v44 = vsub.f32 1.5, %v511_v35  ;;  %v691_v53 = vpop.xlane.xlu0 %690  ;;  %v396_v55 = vpop.xlane.xlu2 %395  ;;  %v521_v50 = vmul.f32 0.5, %v520_v1  ;;  %v604_v61 = vpack.c.bf16 %v589_v13, %v588_v41  ;;  %v752_v30 = vsel %vm2072_vm4, %v1914_v25, %v2024_v2 }
  0xa7   : > { %v1997_v33 = vpop.eup %1592  ;;  %v2002_v7 = vmax.f32 %v691_v53, 1.00000005e-20  ;;  %v694_v57 = vpop.xlane.xlu1 %693  ;;  %1521 = vmatmul.msk.bf16.vlgmr.msra.gmra.mxu1 %vm2723_vm0, %v899_v56  ;;  %v2021_v22 = vmax.f32 %v396_v55, 1.00000005e-20  ;;  %v452_v26 = vsub.f32 1.5, %v451_v9  ;;  %vm769_vm4 = vweird.f32 %v2015_v17 }
  0xa8   : > { %v459_v59 = vmul.f32 %v1997_v33, %v1943_v54  ;;  %v513_v60 = vmul.f32 %v1939_v62, %v512_v44  ;;  %v522_v15 = vsub.f32 1.5, %v521_v50  ;;  %v2017_v3 = vmax.f32 %v694_v57, 1.00000005e-20  ;;  %1513 = vmatmul.msk.bf16.vlgmr.msra.gmra.mxu0 %vm2722_vm1, %v604_v61 }
  0xa9   : > { %1594 = vrsqrt.f32 %v2002_v7  ;;  %v453_v56 = vmul.f32 %v1956_v14, %v452_v26  ;;  %vm465_vm5 = vweird.f32 %v1997_v33  ;;  %vm829_vm10 = vweird.f32 %v2002_v7 }
  0xaa   : > { %v460_v11 = vmul.f32 %v1997_v33, %v459_v59  ;;  %1596 = vrsqrt.f32 %v1995_v52  ;;  %v523_v5 = vmul.f32 %v1976_v34, %v522_v15  ;;  %v517_v35 = vsel %vm2028_vm12, %v1939_v62, %v513_v60  ;;  %vm2107_vm8 = vmor %vm464_vm7, %vm465_vm5 }
  0xab   : > { %1598 = vrsqrt.f32 %v2017_v3  ;;  %v596_v53 = vmul.f32 %v517_v35, %v1768_v18  ;;  %v457_v15 = vsel %vm2098_vm6, %v1956_v14, %v453_v56  ;;  %vm839_vm11 = vweird.f32 %v2017_v3 }
  0xac   : > { %v461_v21 = vmul.f32 0.5, %v460_v11  ;;  %1600 = vrsqrt.f32 %v2015_v17  ;;  %v527_v44 = vsel %vm2044_vm15, %v1976_v34, %v523_v5  ;;  %v590_v39 = vmul.f32 %v457_v15, %v1771_v19 }
  0xad   : > { %1602 = vrsqrt.f32 %v2021_v22  ;;  %v597_v58 = vmul.f32 %v527_v44, %v1774_v20  ;;  %vm534_vm3 = vweird.f32 %v2021_v22 }
  0xae   : > { %v462_v31 = vsub.f32 1.5, %v461_v21  ;;  %v399_v10 = vpop.xlane.xlu0 %398  ;;  %v381_v12 = vpop.xlane.xlu2 %380  ;;  %v762_v21 = vsel %vm2086_vm9, %v1928_v48, %v2063_v49  ;;  %v885_v48 = vmul.f32 %v752_v30, %v1732_v0 }
  0xaf   : > { %v2039_v8 = vpop.eup %1594  ;;  %v2049_v51 = vmax.f32 %v399_v10, 1.00000005e-20  ;;  %v2051_v42 = vmax.f32 %v381_v12, 1.00000005e-20  ;;  %v378_v32 = vpop.xlane.xlu1 %377  ;;  %v608_v20 = vpack.c.bf16 %v597_v58, %v596_v53  ;;  %v886_v18 = vmul.f32 %v762_v21, %v1747_v6 }
  0xb0   : > { %v2053_v43 = vpop.eup %1596  ;;  %v824_v62 = vmul.f32 %v2039_v8, %v2002_v7  ;;  %v463_v34 = vmul.f32 %v1997_v33, %v462_v31  ;;  %v2093_v13 = vmax.f32 %v378_v32, 1.00000005e-20  ;;  %vm830_vm12 = vweird.f32 %v2039_v8 }
  0xb1   : > { %1604 = vrsqrt.f32 %v2049_v51  ;;  %v2080_v57 = vpop.eup %1598  ;;  %v774_v40 = vmul.f32 %v2053_v43, %v1995_v52  ;;  %1517 = vmatmul.msk.bf16.vlgmr.msra.gmra.mxu2 %vm2722_vm1, %v608_v20  ;;  %vm2179_vm14 = vmor %vm829_vm10, %vm830_vm12  ;;  %v900_v6 = vpack.c.bf16 %v886_v18, %v885_v48  ;;  %vm544_vm5 = vweird.f32 %v2049_v51 }
  0xb2   : > { %v825_v1 = vmul.f32 %v2039_v8, %v824_v62  ;;  %1606 = vrsqrt.f32 %v2051_v42  ;;  %v834_v59 = vmul.f32 %v2080_v57, %v2017_v3  ;;  %v2105_v50 = vpop.eup %1600  ;;  %v467_v61 = vsel %vm2107_vm8, %v1997_v33, %v463_v34 }
  0xb3   : > { %1608 = vrsqrt.f32 %v2093_v13  ;;  %v2116_v60 = vpop.eup %1602  ;;  %v775_v2 = vmul.f32 %v2053_v43, %v774_v40  ;;  %v591_v5 = vmul.f32 %v467_v61, %v1786_v27  ;;  %v764_v33 = vmul.f32 %v2105_v50, %v2015_v17 }
  0xb4   : > { %v826_v16 = vmul.f32 0.5, %v825_v1  ;;  %v835_v54 = vmul.f32 %v2080_v57, %v834_v59  ;;  %v529_v12 = vmul.f32 %v2116_v60, %v2021_v22  ;;  %vm840_vm13 = vweird.f32 %v2080_v57 }
  0xb5   : > { %v2155_v62 = vmul.f32 0.5, %v775_v2  ;;  %v605_v49 = vpack.c.bf16 %v591_v5, %v590_v39  ;;  %v765_v56 = vmul.f32 %v2105_v50, %v764_v33  ;;  %vm770_vm15 = vweird.f32 %v2105_v50  ;;  %vm2201_vm2 = vmor %vm839_vm11, %vm840_vm13 }
  0xb6   : > { %v679_v9 = vpop.xlane.xlu0 %678  ;;  %v697_v11 = vpop.xlane.xlu2 %696  ;;  %v827_v26 = vsub.f32 1.5, %v826_v16  ;;  %v836_v31 = vmul.f32 0.5, %v835_v54  ;;  %v530_v34 = vmul.f32 %v2116_v60, %v529_v12  ;;  %vm484_vm9 = vweird.f32 %v2051_v42 }
  0xb7   : > { %v2129_v25 = vpop.eup %1604  ;;  %v2133_v23 = vmax.f32 %v679_v9, 1.00000005e-20  ;;  %v2135_v24 = vmax.f32 %v697_v11, 1.00000005e-20  ;;  %v682_v14 = vpop.xlane.xlu1 %681  ;;  %v777_v11 = vsub.f32 1.5, %v2155_v62  ;;  %v766_v2 = vmul.f32 0.5, %v765_v56  ;;  %1522 = vmatmul.msk.bf16.gmra.mxu1 %vm2723_vm0, %v900_v6 }
  0xb8   : > { %v2141_v10 = vpop.eup %1606  ;;  %v539_v35 = vmul.f32 %v2129_v25, %v2049_v51  ;;  %v837_v27 = vsub.f32 1.5, %v836_v31  ;;  %v2158_v44 = vmax.f32 %v682_v14, 1.00000005e-20  ;;  %v828_v53 = vmul.f32 %v2039_v8, %v827_v26  ;;  %1514 = vmatmul.msk.bf16.gmra.mxu0 %vm2722_vm1, %v605_v49 }
  0xb9   : > { %1610 = vrsqrt.f32 %v2133_v23  ;;  %v479_v0 = vmul.f32 %v2141_v10, %v2051_v42  ;;  %v2153_v32 = vpop.eup %1608  ;;  %v531_v14 = vmul.f32 0.5, %v530_v34  ;;  %vm474_vm6 = vweird.f32 %v2093_v13 }
  0xba   : > { %1612 = vrsqrt.f32 %v2135_v24  ;;  %v469_v55 = vmul.f32 %v2153_v32, %v2093_v13  ;;  %v540_v1 = vmul.f32 %v2129_v25, %v539_v35  ;;  %v838_v40 = vmul.f32 %v2080_v57, %v837_v27 }
  0xbb   : > { %v480_v19 = vmul.f32 %v2141_v10, %v479_v0  ;;  %1614 = vrsqrt.f32 %v2158_v44  ;;  %v832_v7 = vsel %vm2179_vm14, %v2039_v8, %v828_v53  ;;  %vm475_vm7 = vweird.f32 %v2153_v32 }
  0xbc   : > { %v470_v63 = vmul.f32 %v2153_v32, %v469_v55  ;;  %v541_v33 = vmul.f32 0.5, %v540_v1  ;;  %v842_v3 = vsel %vm2201_vm2, %v2080_v57, %v838_v40  ;;  %v893_v35 = vmul.f32 %v832_v7, %v1804_v36  ;;  %vm2239_vm12 = vmor %vm474_vm6, %vm475_vm7 }
  0xbd   : > { %v481_v58 = vmul.f32 0.5, %v480_v19  ;;  %vm779_vm8 = vweird.f32 %v1995_v52  ;;  %vm780_vm10 = vweird.f32 %v2053_v43  ;;  %v767_v27 = vsub.f32 1.5, %v766_v2 }
  0xbe   : > { %v700_v16 = vpop.xlane.xlu0 %699  ;;  %v405_v59 = vpop.xlane.xlu2 %404  ;;  %v471_v15 = vmul.f32 0.5, %v470_v63  ;;  %v532_v0 = vsub.f32 1.5, %v531_v14  ;;  %v894_v36 = vmul.f32 %v842_v3, %v1810_v38  ;;  %v542_v49 = vsub.f32 1.5, %v541_v33 }
  0xbf   : > { %v2173_v41 = vpop.eup %1610  ;;  %v2184_v30 = vmax.f32 %v700_v16, 1.00000005e-20  ;;  %v2186_v54 = vmax.f32 %v405_v59, 1.00000005e-20  ;;  %v402_v9 = vpop.xlane.xlu1 %401  ;;  %v482_v8 = vsub.f32 1.5, %v481_v58  ;;  %vm485_vm11 = vweird.f32 %v2141_v10 }
  0xc0   : > { %v784_v61 = vmul.f32 %v2173_v41, %v2133_v23  ;;  %v2194_v21 = vpop.eup %1612  ;;  %v472_v26 = vsub.f32 1.5, %v471_v15  ;;  %v2217_v12 = vmax.f32 %v402_v9, 1.00000005e-20  ;;  %v904_v18 = vpack.c.bf16 %v894_v36, %v893_v35  ;;  %vm2264_vm2 = vmor %vm484_vm9, %vm485_vm11 }
  0xc1   : > { %1616 = vrsqrt.f32 %v2184_v30  ;;  %v844_v31 = vmul.f32 %v2194_v21, %v2135_v24  ;;  %v2224_v57 = vpop.eup %1614  ;;  %v483_v53 = vmul.f32 %v2141_v10, %v482_v8  ;;  %vm535_vm13 = vweird.f32 %v2116_v60  ;;  %vm2286_vm9 = vmor %vm769_vm4, %vm770_vm15 }
  0xc2   : > { %v785_v48 = vmul.f32 %v2173_v41, %v784_v61  ;;  %1618 = vrsqrt.f32 %v2186_v54  ;;  %v473_v39 = vmul.f32 %v2153_v32, %v472_v26  ;;  %v794_v16 = vmul.f32 %v2224_v57, %v2158_v44  ;;  %1526 = vmatmul.msk.bf16.vlgmr.msra.gmra.mxu3 %vm2723_vm0, %v904_v18  ;;  %vm2302_vm15 = vmor %vm534_vm3, %vm535_vm13 }
  0xc3   : > { %1620 = vrsqrt.f32 %v2217_v12  ;;  %v845_v19 = vmul.f32 %v2194_v21, %v844_v31  ;;  %v768_v6 = vmul.f32 %v2105_v50, %v767_v27  ;;  %v533_v9 = vmul.f32 %v2116_v60, %v532_v0  ;;  %vm2339_vm11 = vmor %vm779_vm8, %vm780_vm10 }
  0xc4   : > { %v786_v38 = vmul.f32 0.5, %v785_v48  ;;  %v477_v13 = vsel %vm2239_vm12, %v2153_v32, %v473_v39  ;;  %vm545_vm14 = vweird.f32 %v2129_v25  ;;  %v543_v32 = vmul.f32 %v2129_v25, %v542_v49 }
  0xc5   : > { %v846_v61 = vmul.f32 0.5, %v845_v19  ;;  %v487_v2 = vsel %vm2264_vm2, %v2141_v10, %v483_v53  ;;  %v592_v33 = vmul.f32 %v477_v13, %v1828_v47  ;;  %v795_v26 = vmul.f32 %v2224_v57, %v794_v16  ;;  %vm2313_vm6 = vmor %vm544_vm5, %vm545_vm14 }
  0xc6   : > { %v384_v55 = vpop.xlane.xlu0 %383  ;;  %v685_v56 = vpop.xlane.xlu2 %684  ;;  %v787_v42 = vsub.f32 1.5, %v786_v38  ;;  %v778_v47 = vmul.f32 %v2053_v43, %v777_v11  ;;  %vm554_vm4 = vweird.f32 %v2217_v12  ;;  %v593_v48 = vmul.f32 %v487_v2, %v1825_v46 }
  0xc7   : > { %v2233_v34 = vpop.eup %1616  ;;  %v2243_v40 = vmax.f32 %v384_v55, 1.00000005e-20  ;;  %v2245_v58 = vmax.f32 %v685_v56, 1.00000005e-20  ;;  %v387_v63 = vpop.xlane.xlu1 %386  ;;  %v847_v11 = vsub.f32 1.5, %v846_v61  ;;  %vm564_vm3 = vweird.f32 %v2186_v54 }
  0xc8   : > { %v854_v59 = vmul.f32 %v2233_v34, %v2184_v30  ;;  %v2255_v20 = vpop.eup %1618  ;;  %v2279_v5 = vmax.f32 %v387_v63, 1.00000005e-20  ;;  %v537_v39 = vsel %vm2302_vm15, %v2116_v60, %v533_v9  ;;  %v2325_v0 = vmul.f32 %v2173_v41, %v787_v42 }
  0xc9   : > { %1622 = vrsqrt.f32 %v2243_v40  ;;  %v559_v7 = vmul.f32 %v2255_v20, %v2186_v54  ;;  %v2276_v14 = vpop.eup %1620  ;;  %vm789_vm5 = vweird.f32 %v2133_v23  ;;  %vm790_vm7 = vweird.f32 %v2173_v41 }
  0xca   : > { %1624 = vrsqrt.f32 %v2245_v58  ;;  %v855_v10 = vmul.f32 %v2233_v34, %v854_v59  ;;  %v549_v3 = vmul.f32 %v2276_v14, %v2217_v12  ;;  %v606_v51 = vpack.c.bf16 %v593_v48, %v592_v33 }
  0xcb   : > { %v560_v31 = vmul.f32 %v2255_v20, %v559_v7  ;;  %1626 = vrsqrt.f32 %v2279_v5  ;;  %v547_v36 = vsel %vm2313_vm6, %v2129_v25, %v543_v32  ;;  %v772_v49 = vsel %vm2286_vm9, %v2105_v50, %v768_v6 }
  0xcc   : > { %v550_v35 = vmul.f32 %v2276_v14, %v549_v3  ;;  %v796_v19 = vmul.f32 0.5, %v795_v26  ;;  %vm799_vm12 = vweird.f32 %v2158_v44  ;;  %vm800_vm13 = vweird.f32 %v2224_v57  ;;  %1515 = vmatmul.msk.bf16.gmra.mxu0 %vm2722_vm1, %v606_v51 }
  0xcd   : > { %v561_v22 = vmul.f32 0.5, %v560_v31  ;;  %v856_v55 = vmul.f32 0.5, %v855_v10  ;;  %vm849_vm14 = vweird.f32 %v2135_v24  ;;  %vm850_vm2 = vweird.f32 %v2194_v21 }
  0xce   : > { %v688_v27 = vpop.xlane.xlu0 %687  ;;  %v551_v25 = vmul.f32 0.5, %v550_v35  ;;  %v598_v52 = vmul.f32 %v537_v39, %v1807_v37  ;;  %v599_v1 = vmul.f32 %v547_v36, %v1822_v45  ;;  %v782_v38 = vsel %vm2339_vm11, %v2053_v43, %v778_v47  ;;  %v706_v9 = vpop.xlane.xlu2 %705 }
  0xcf   : > { %v2322_v46 = vpop.eup %1622  ;;  %v703_v60 = vpop.xlane.xlu1 %702  ;;  %v887_v18 = vmul.f32 %v772_v49, %v1792_v29  ;;  %v2359_v63 = vmul.f32 %v2194_v21, %v847_v11  ;;  %vm859_vm8 = vweird.f32 %v2184_v30  ;;  %vm860_vm10 = vweird.f32 %v2233_v34  ;;  %v1646_v30 = vld [vmem:[%s1724_s22 + $0x78] sm:$0xff] }
  0xd0   : > { %v489_v56 = vmul.f32 %v2322_v46, %v2243_v40  ;;  %v2347_v50 = vpop.eup %1624  ;;  %v562_v16 = vsub.f32 1.5, %v561_v22  ;;  %v552_v59 = vsub.f32 1.5, %v551_v25  ;;  %vm494_vm9 = vweird.f32 %v2243_v40 }
  0xd1   : > { %v2364_v37 = vpop.eup %1626  ;;  %v804_v45 = vmul.f32 %v2347_v50, %v2245_v58  ;;  %v609_v43 = vpack.c.bf16 %v599_v1, %v598_v52  ;;  %v888_v29 = vmul.f32 %v782_v38, %v1789_v28  ;;  %v2370_v6 = vmax.f32 %v688_v27, 1.00000005e-20  ;;  %v1639_v1 = vld [vmem:[%s1724_s22 + $0x30] sm:$0xff] }
  0xd2   : > { %v490_v13 = vmul.f32 %v2322_v46, %v489_v56  ;;  %v797_v15 = vsub.f32 1.5, %v796_v19  ;;  %vm555_vm15 = vweird.f32 %v2276_v14  ;;  %v499_v61 = vmul.f32 %v2364_v37, %v2279_v5 }
  0xd3   : > { %v857_v7 = vsub.f32 1.5, %v856_v55  ;;  %v553_v2 = vmul.f32 %v2276_v14, %v552_v59  ;;  %1518 = vmatmul.msk.bf16.gmra.mxu2 %vm2722_vm1, %v609_v43  ;;  %v901_v42 = vpack.c.bf16 %v888_v29, %v887_v18  ;;  %1628 = vrsqrt.f32 %v2370_v6  ;;  %vm2394_vm11 = vmor %vm554_vm4, %vm555_vm15  ;;  %v1640_v18 = vld [vmem:[%s1724_s22 + $0x38] sm:$0xff]  ;;  %v1642_v29 = vld [vmem:[%s1724_s22 + $0x68] sm:$0xff] }
  0xd4   : > { %v491_v32 = vmul.f32 0.5, %v490_v13  ;;  %v563_v28 = vmul.f32 %v2255_v20, %v562_v16  ;;  %vm565_vm6 = vweird.f32 %v2255_v20  ;;  %v500_v33 = vmul.f32 %v2364_v37, %v499_v61  ;;  %vm2418_vm15 = vmor %vm789_vm5, %vm790_vm7 }
  0xd5   : > { %v2381_v8 = vmax.f32 %v706_v9, 1.00000005e-20  ;;  %v805_v31 = vmul.f32 %v2347_v50, %v804_v45  ;;  %1523 = vmatmul.msk.bf16.gmra.mxu1 %vm2723_vm0, %v901_v42  ;;  %v2385_v3 = vmax.f32 %v703_v60, 1.00000005e-20  ;;  %v798_v48 = vmul.f32 %v2224_v57, %v797_v15  ;;  %vm2405_vm0 = vmor %vm564_vm3, %vm565_vm6  ;;  %v1641_v45 = vld [vmem:[%s1724_s22 + $0x60] sm:$0xff]  ;;  %v1643_v42 = vld [vmem:[%s1729_s25 + $0x30] sm:$0xff] }
  0xd6   : > { %v408_v26 = vpop.xlane.xlu0 %407  ;;  %v492_v10 = vsub.f32 1.5, %v491_v32  ;;  %v501_v11 = vmul.f32 0.5, %v500_v33  ;;  %vm504_vm1 = vweird.f32 %v2279_v5  ;;  %v858_v22 = vmul.f32 %v2233_v34, %v857_v7  ;;  %vm2434_vm3 = vmor %vm799_vm12, %vm800_vm13 }
  0xd7   : > { %v2387_v47 = vmax.f32 %v408_v26, 1.00000005e-20  ;;  %v411_v17 = vpop.xlane.xlu1 %410  ;;  %1630 = vrsqrt.f32 %v2381_v8  ;;  %vm495_vm4 = vweird.f32 %v2322_v46  ;;  %v557_v12 = vsel %vm2394_vm11, %v2276_v14, %v553_v2  ;;  %vm2465_vm12 = vmor %vm859_vm8, %vm860_vm10 }
  0xd8   : > { %1632 = vrsqrt.f32 %v2385_v3  ;;  %v502_v54 = vsub.f32 1.5, %v501_v11  ;;  %v2423_v27 = vmax.f32 %v411_v17, 1.00000005e-20  ;;  %v567_v51 = vsel %vm2405_vm0, %v2255_v20, %v563_v28  ;;  %vm2447_vm0 = vmor %vm849_vm14, %vm850_vm2 }
  0xd9   : > { %1634 = vrsqrt.f32 %v2387_v47  ;;  %v2428_v36 = vpop.eup %1628  ;;  %v493_v14 = vmul.f32 %v2322_v46, %v492_v10  ;;  %v2439_v49 = vmul.f32 0.5, %v805_v31  ;;  %vm505_vm5 = vweird.f32 %v2364_v37  ;;  %vm2479_vm14 = vmor %vm494_vm9, %vm495_vm4 }
  0xda   : > { %vm879_vm7 = vweird.f32 %v2381_v8  ;;  %v814_v44 = vmul.f32 %v2428_v36, %v2370_v6  ;;  %1636 = vrsqrt.f32 %v2423_v27  ;;  %v792_v60 = vsel %vm2418_vm15, %v2173_v41, %v2325_v0  ;;  %v1638_v0 = vld [vmem:[%s1729_s25 + $0x68] sm:$0xff]  ;;  %vm2509_vm9 = vmor %vm504_vm1, %vm505_vm5 }
  0xdb   : > { %v802_v53 = vsel %vm2434_vm3, %v2224_v57, %v798_v48  ;;  %v503_v19 = vmul.f32 %v2364_v37, %v502_v54  ;;  %vm869_vm13 = vweird.f32 %v2385_v3  ;;  %v600_v41 = vmul.f32 %v557_v12, %v1848_v4 }
  0xdc   : > { %v601_v55 = vmul.f32 %v1638_v0, %v567_v51  ;;  %vm809_vm2 = vweird.f32 %v2245_v58  ;;  %vm810_vm8 = vweird.f32 %v2347_v50  ;;  %v815_v57 = vmul.f32 %v2428_v36, %v814_v44 }
  0xdd   : > { %v2473_v25 = vpop.eup %1630  ;;  %vm574_vm10 = vweird.f32 %v2387_v47  ;;  %v852_v4 = vsel %vm2447_vm0, %v2194_v21, %v2359_v63  ;;  %v862_v40 = vsel %vm2465_vm12, %v2233_v34, %v858_v22  ;;  %v889_v38 = vmul.f32 %v1639_v1, %v792_v60 }
  0xde   : > { %v2494_v56 = vpop.eup %1632  ;;  %v874_v52 = vmul.f32 %v2473_v25, %v2381_v8  ;;  %v890_v16 = vmul.f32 %v1640_v18, %v802_v53  ;;  %v497_v59 = vsel %vm2479_vm14, %v2322_v46, %v493_v14  ;;  %v816_v34 = vmul.f32 0.5, %v815_v57 }
  0xdf   : > { %v2503_v13 = vpop.eup %1634  ;;  %v864_v63 = vmul.f32 %v2494_v56, %v2385_v3  ;;  %v895_v43 = vmul.f32 %v1641_v45, %v852_v4  ;;  %v896_v9 = vmul.f32 %v1642_v29, %v862_v40  ;;  %v610_v32 = vpack.c.bf16 %v601_v55, %v600_v41  ;;  %v1645_v55 = vld [vmem:[%s1724_s22 + $0x70] sm:$0xff] }
  0xe0   : > { %v875_v46 = vmul.f32 %v2473_v25, %v874_v52  ;;  %v569_v15 = vmul.f32 %v2503_v13, %v2387_v47  ;;  %v507_v5 = vsel %vm2509_vm9, %v2364_v37, %v503_v19  ;;  %v1637_v61 = vpop.eup %1636  ;;  %vm880_vm1 = vweird.f32 %v2473_v25  ;;  %v1644_v37 = vld [vmem:[%s1729_s25 + $0x38] sm:$0xff]  ;;  %v1647_v4 = vld [vmem:[%s1729_s25 + $0x70] sm:$0xff] }
  0xe1   : > { %v865_v7 = vmul.f32 %v2494_v56, %v864_v63  ;;  %v905_v2 = vpack.c.bf16 %v896_v9, %v895_v43  ;;  %v594_v28 = vmul.f32 %v1643_v42, %v497_v59  ;;  %v579_v10 = vmul.f32 %v1637_v61, %v2423_v27  ;;  %vm2538_vm3 = vmor %vm879_vm7, %vm880_vm1  ;;  %v1648_v52 = vld [vmem:[%s1729_s25 + $0x78] sm:$0xff]  ;;  %v1650_v59 = vld [vmem:[%s1724_s22 + $0x40] sm:$0xff] }
  0xe2   : > { %v876_v33 = vmul.f32 0.5, %v875_v46  ;;  %v570_v26 = vmul.f32 %v2503_v13, %v569_v15  ;;  %v902_v31 = vpack.c.bf16 %v890_v16, %v889_v38  ;;  %v817_v17 = vsub.f32 1.5, %v816_v34  ;;  %v1649_v38 = vld [vmem:[%s1724_s22 + $0x48] sm:$0xff] }
  0xe3   : > { %v866_v48 = vmul.f32 0.5, %v865_v7  ;;  %vm870_vm6 = vweird.f32 %v2494_v56  ;;  %vm2774_vm11 = vcmask 130048   ;;  %v595_v62 = vmul.f32 %v1644_v37, %v507_v5 }
  0xe4   : > { %1527 = vmatmul.msk.bf16.gmra.mxu3 %vm2774_vm11, %v905_v2  ;;  %v877_v11 = vsub.f32 1.5, %v876_v33  ;;  %v571_v22 = vmul.f32 0.5, %v570_v26  ;;  %vm575_vm4 = vweird.f32 %v2503_v13  ;;  %v580_v35 = vmul.f32 %v1637_v61, %v579_v10  ;;  %vm2548_vm0 = vmor %vm869_vm13, %vm870_vm6 }
  0xe5   : > { %vm2775_vm15 = vcmask 261120   ;;  %v807_v12 = vsub.f32 1.5, %v2439_v49  ;;  %v867_v54 = vsub.f32 1.5, %v866_v48  ;;  %vm584_vm5 = vweird.f32 %v2423_v27  ;;  %vm2780_vm12 = vmmov %vm2774_vm11 }
  0xe6   : > { %1519 = vmatmul.msk.bf16.gmra.mxu2 %vm2775_vm15, %v610_v32  ;;  %v607_v51 = vpack.c.bf16 %v595_v62, %v594_v28  ;;  %v878_v23 = vmul.f32 %v2473_v25, %v877_v11  ;;  %v572_v49 = vsub.f32 1.5, %v571_v22  ;;  %v581_v8 = vmul.f32 0.5, %v580_v35  ;;  %1524 = vmatmul.msk.bf16.gmra.mxu1 %vm2780_vm12, %v902_v31  ;;  %vm2561_vm13 = vmor %vm574_vm10, %vm575_vm4 }
  0xe7   : > { %vm585_vm7 = vweird.f32 %v1637_v61  ;;  %v818_v20 = vmul.f32 %v2428_v36, %v817_v17  ;;  %vm819_vm14 = vweird.f32 %v2370_v6  ;;  %vm820_vm9 = vweird.f32 %v2428_v36  ;;  %vm2783_vm1 = vmmov %vm2775_vm15 }
  0xe8   : > { %v868_v44 = vmul.f32 %v2494_v56, %v867_v54  ;;  %1516 = vmatmul.msk.bf16.gmra.mxu0 %vm2783_vm1, %v607_v51  ;;  %vm2570_vm6 = vmor %vm809_vm2, %vm810_vm8  ;;  %v573_v60 = vmul.f32 %v2503_v13, %v572_v49  ;;  %v582_v53 = vsub.f32 1.5, %v581_v8  ;;  %v882_v47 = vsel %vm2538_vm3, %v2473_v25, %v878_v23 }
  0xe9   : > { %v808_v24 = vmul.f32 %v2347_v50, %v807_v12  ;;  %vm586_vm10 = vmor %vm584_vm5, %vm585_vm7  ;;  %v898_v57 = vmul.f32 %v1646_v30, %v882_v47  ;;  %vm1188_vm15 = vcmask 7168  }
  0xea   : > { %v872_v58 = vsel %vm2548_vm0, %v2494_v56, %v868_v44  ;;  %vm821_vm2 = vmor %vm819_vm14, %vm820_vm9  ;;  %v583_v19 = vmul.f32 %v1637_v61, %v582_v53  ;;  %v577_v41 = vsel %vm2561_vm13, %v2503_v13, %v573_v60 }
  0xeb   : > { %v822_v0 = vsel %vm821_vm2, %v2428_v36, %v818_v20  ;;  %v897_v25 = vmul.f32 %v1645_v55, %v872_v58  ;;  %v602_v40 = vmul.f32 %v1647_v4, %v577_v41  ;;  %v812_v56 = vsel %vm2570_vm6, %v2347_v50, %v808_v24  ;;  %vm2786_vm8 = vmmov %vm2774_vm11 }
  0xec   : > { %v587_v27 = vsel %vm586_vm10, %v1637_v61, %v583_v19  ;;  %v892_v18 = vmul.f32 %v1649_v38, %v822_v0  ;;  %v891_v13 = vmul.f32 %v1650_v59, %v812_v56  ;;  %vm2787_vm11 = vmmov %vm2783_vm1 }
  0xed   : > { %v603_v1 = vmul.f32 %v1648_v52, %v587_v27  ;;  %v906_v16 = vpack.c.bf16 %v898_v57, %v897_v25  ;;  %vm2788_vm4 = vmmov %vm2786_vm8 }
  0xee   : > { %v903_v36 = vpack.c.bf16 %v892_v18, %v891_v13 }
  0xef   : > { %v611_v21 = vpack.c.bf16 %v603_v1, %v602_v40 }
  0xf4   : > { %1528 = vmatmul.msk.bf16.gmra.mxu3 %vm2786_vm8, %v906_v16 }
  0xf6   : > { %1520 = vmatmul.msk.bf16.gmra.mxu2 %vm2787_vm11, %v611_v21  ;;  %1525 = vmatmul.msk.bf16.gmra.mxu1 %vm2788_vm4, %v903_v36 }
 0x124   : > { %v1036_v34 = vpop.f32.mrf.mxu1 }
 0x125   : > { %v1076_v63 = vmax.f32 %v1036_v34, 0.0  ;;  %v963_v43 = vpop.f32.mrf.mxu0 }
 0x126   : > { %1108 = vadd.xlane.f32.xlu2 %v963_v43 }
 0x127   : > { %v1092_v45 = vsub.f32 0.0, %v1076_v63 }
 0x129   : > { %v1269_v50 = vmul.f32 %v1092_v45, %v963_v43 }
 0x12c   : > { %v1038_v29 = vpop.f32.mrf.mxu1 }
 0x12d   : > { %v1077_v9 = vmax.f32 %v1038_v29, 0.0  ;;  %v965_v15 = vpop.f32.mrf.mxu0 }
 0x12e   : > { %1140 = vadd.xlane.f32.xlu2 %v1092_v45  ;;  %1110 = vadd.xlane.f32.xlu0 %v965_v15 }
 0x12f   : > { %v1093_v46 = vsub.f32 0.0, %v1077_v9 }
 0x131   : > { %v1270_v32 = vmul.f32 %v1093_v46, %v965_v15 }
 0x133   : > { %v1285_v5 = vadd.f32 %v1270_v32, %v1269_v50 }
 0x134   : > { %v2600_v61 = vpop.f32.mrf.mxu2  ;;  %v1041_v7 = vpop.f32.mrf.mxu1 }
 0x135   : > { %v968_v2 = vpop.f32.mrf.mxu0  ;;  %v1078_v39 = vmax.f32 %v1041_v7, 0.0 }
 0x136   : > { %1124 = vadd.xlane.f32.xlu2 %v2600_v61 }
 0x137   : > { %v1094_v51 = vsub.f32 0.0, %v1078_v39 }
 0x139   : > { %v1271_v6 = vmul.f32 %v1094_v51, %v968_v2 }
 0x13b   : > { %v1286_v19 = vadd.f32 %v1285_v5, %v1271_v6 }
 0x13c   : > { %v2603_v42 = vpop.f32.mrf.mxu2  ;;  %v1043_v28 = vpop.f32.mrf.mxu1 }
 0x13d   : > { %1126 = vadd.xlane.f32.xlu1 %v2603_v42  ;;  %v970_v33 = vpop.f32.mrf.mxu0  ;;  %v1079_v37 = vmax.f32 %v1043_v28, 0.0 }
 0x13f   : > { %v1095_v12 = vsub.f32 0.0, %v1079_v37 }
 0x141   : > { %v1272_v47 = vmul.f32 %v1095_v12, %v970_v33 }
 0x143   : > { %v1287_v55 = vadd.f32 %v1286_v19, %v1272_v47 }
 0x145   : > { %1112 = vadd.xlane.f32.xlu1 %v968_v2  ;;  %v1061_v26 = vpop.f32.mrf.mxu3 }
 0x146   : > { %v1086_v10 = vmax.f32 %v1061_v26, 0.0 }
 0x148   : > { %v2606_v31 = vsub.f32 0.0, %v1086_v10 }
 0x149   : > { %v973_v11 = vpop.f32.mrf.mxu0 }
 0x14a   : > { %1160 = vadd.xlane.f32.xlu0 %v2606_v31 }
 0x14d   : > { %1114 = vadd.xlane.f32.xlu1 %v970_v33  ;;  %v1063_v48 = vpop.f32.mrf.mxu3 }
 0x14e   : > { %v1087_v62 = vmax.f32 %v1063_v48, 0.0 }
 0x150   : > { %v2609_v22 = vsub.f32 0.0, %v1087_v62 }
 0x151   : > { %v975_v23 = vpop.f32.mrf.mxu0 }
 0x152   : > { %v1046_v17 = vpop.f32.mrf.mxu1  ;;  %1142 = vadd.xlane.f32.xlu0 %v1093_v46  ;;  %1162 = vadd.xlane.f32.xlu2 %v2609_v22 }
 0x153   : > { %v1080_v8 = vmax.f32 %v1046_v17, 0.0 }
 0x155   : > { %1146 = vadd.xlane.f32.xlu1 %v1095_v12  ;;  %v1096_v60 = vsub.f32 0.0, %v1080_v8 }
 0x156   : > { %v988_v35 = vpop.f32.mrf.mxu2 }
 0x157   : > { %v1273_v41 = vmul.f32 %v1096_v60, %v973_v11  ;;  %v1279_v9 = vmul.f32 %v2606_v31, %v988_v35 }
 0x159   : > { %v1288_v27 = vadd.f32 %v1287_v55, %v1273_v41 }
 0x15a   : > { %v1048_v54 = vpop.f32.mrf.mxu1  ;;  %1128 = vadd.xlane.f32.xlu0 %v988_v35  ;;  %1144 = vadd.xlane.f32.xlu2 %v1094_v51 }
 0x15b   : > { %v1081_v3 = vmax.f32 %v1048_v54, 0.0 }
 0x15d   : > { %v1097_v24 = vsub.f32 0.0, %v1081_v3 }
 0x15e   : > { %v2612_v14 = vpop.f32.mrf.mxu2 }
 0x15f   : > { %v1274_v25 = vmul.f32 %v1097_v24, %v975_v23  ;;  %v1280_v33 = vmul.f32 %v2609_v22, %v2612_v14 }
 0x161   : > { %v1289_v1 = vadd.f32 %v1288_v27, %v1274_v25 }
 0x162   : > { %1130 = vadd.xlane.f32.xlu2 %v2612_v14  ;;  %1116 = vadd.xlane.f32.xlu0 %v973_v11 }
 0x163   : > { %v1051_v49 = vpop.f32.mrf.mxu1 }
 0x164   : > { %v1082_v58 = vmax.f32 %v1051_v49, 0.0 }
 0x165   : > { %v978_v44 = vpop.f32.mrf.mxu0 }
 0x166   : > { %v1098_v30 = vsub.f32 0.0, %v1082_v58 }
 0x167   : > { %v1066_v4 = vpop.f32.mrf.mxu3 }
 0x168   : > { %v1275_v40 = vmul.f32 %v1098_v30, %v978_v44  ;;  %v1088_v46 = vmax.f32 %v1066_v4, 0.0 }
 0x169   : > { %v2614_v20 = vpop.f32.mrf.mxu2 }
 0x16a   : > { %1132 = vadd.xlane.f32.xlu1 %v2614_v20  ;;  %1118 = vadd.xlane.f32.xlu2 %v975_v23  ;;  %v1290_v16 = vadd.f32 %v1289_v1, %v1275_v40 }
 0x16b   : > { %v1053_v53 = vpop.f32.mrf.mxu1  ;;  %1148 = vadd.xlane.f32.xlu0 %v1096_v60 }
 0x16c   : > { %v1083_v0 = vmax.f32 %v1053_v53, 0.0 }
 0x16d   : > { %v980_v57 = vpop.f32.mrf.mxu0 }
 0x16e   : > { %v1099_v56 = vsub.f32 0.0, %v1083_v0 }
 0x16f   : > { %v1068_v45 = vpop.f32.mrf.mxu3 }
 0x170   : > { %v1276_v38 = vmul.f32 %v1099_v56, %v980_v57  ;;  %v1089_v28 = vmax.f32 %v1068_v45, 0.0 }
 0x171   : > { %v995_v13 = vpop.f32.mrf.mxu2 }
 0x172   : > { %1120 = vadd.xlane.f32.xlu1 %v978_v44  ;;  %v1291_v21 = vadd.f32 %v1290_v16, %v1276_v38  ;;  %1150 = vadd.xlane.f32.xlu2 %v1097_v24  ;;  %v1105_v26 = vsub.f32 0.0, %v1089_v28 }
 0x173   : > { %v1056_v52 = vpop.f32.mrf.mxu1  ;;  %1134 = vadd.xlane.f32.xlu0 %v995_v13 }
 0x174   : > { %v1084_v18 = vmax.f32 %v1056_v52, 0.0  ;;  %v1282_v11 = vmul.f32 %v1105_v26, %v995_v13 }
 0x176   : > { %v1100_v59 = vsub.f32 0.0, %v1084_v18 }
 0x177   : > { %v1071_v7 = vpop.f32.mrf.mxu3 }
 0x178   : > { %v1277_v36 = vmul.f32 %v1100_v59, %v2600_v61  ;;  %v1104_v61 = vsub.f32 0.0, %v1088_v46  ;;  %v1090_v2 = vmax.f32 %v1071_v7, 0.0 }
 0x179   : > { %v998_v5 = vpop.f32.mrf.mxu2 }
 0x17a   : > { %1152 = vadd.xlane.f32.xlu1 %v1098_v30  ;;  %v1292_v34 = vadd.f32 %v1291_v21, %v1277_v36  ;;  %1156 = vadd.xlane.f32.xlu2 %v1100_v59  ;;  %v1281_v31 = vmul.f32 %v1104_v61, %v2614_v20 }
 0x17b   : > { %v1058_v63 = vpop.f32.mrf.mxu1  ;;  %1122 = vadd.xlane.f32.xlu0 %v980_v57 }
 0x17c   : > { %v1085_v43 = vmax.f32 %v1058_v63, 0.0 }
 0x17e   : > { %v1101_v50 = vsub.f32 0.0, %v1085_v43 }
 0x17f   : > { %v1073_v48 = vpop.f32.mrf.mxu3 }
 0x180   : > { %v1278_v29 = vmul.f32 %v1101_v50, %v2603_v42  ;;  %v1106_v42 = vsub.f32 0.0, %v1090_v2  ;;  %v1091_v37 = vmax.f32 %v1073_v48, 0.0 }
 0x181   : > { %v1000_v17 = vpop.f32.mrf.mxu2 }
 0x182   : > { %1158 = vadd.xlane.f32.xlu1 %v1101_v50  ;;  %v1293_v15 = vadd.f32 %v1292_v34, %v1278_v29  ;;  %1136 = vadd.xlane.f32.xlu2 %v998_v5  ;;  %v1107_v35 = vsub.f32 0.0, %v1091_v37  ;;  %v1283_v39 = vmul.f32 %v1106_v42, %v998_v5 }
 0x183   : > { %1154 = vadd.xlane.f32.xlu0 %v1099_v56 }
 0x184   : > { %v1294_v32 = vadd.f32 %v1293_v15, %v1279_v9  ;;  %v1284_v51 = vmul.f32 %v1107_v35, %v1000_v17 }
 0x186   : > { %v1295_v10 = vadd.f32 %v1294_v32, %v1280_v33 }
 0x188   : > { %v1296_v62 = vadd.f32 %v1295_v10, %v1281_v31 }
 0x18a   : > { %1164 = vadd.xlane.f32.xlu1 %v1104_v61  ;;  %1168 = vadd.xlane.f32.xlu2 %v1106_v42  ;;  %v1297_v12 = vadd.f32 %v1296_v62, %v1282_v11 }
 0x18b   : > { %1166 = vadd.xlane.f32.xlu0 %v1105_v26 }
 0x18c   : > { %v1298_v54 = vadd.f32 %v1297_v12, %v1283_v39 }
 0x18e   : > { %v1299_v22 = vadd.f32 %v1298_v54, %v1284_v51 }
 0x192   : > { %1138 = vadd.xlane.f32.xlu1 %v1000_v17 }
 0x193   : > { %1170 = vadd.xlane.f32.xlu0 %v1107_v35 }
 0x199   : > { %v1109_v23 = vpop.xlane.xlu2 %1108 }
 0x19a   : > { %v1189_v27 = vsel %vm1188_vm15, %v1109_v23, 0.0  ;;  %v1172_v52 = vmul.f32 0.015625, %v1109_v23 }
 0x19b   : > { %1300 = vadd.xlane.f32.xlu0 %v1299_v22 }
 0x1a1   : > { %v1141_v49 = vpop.xlane.xlu2 %1140  ;;  %v1111_v8 = vpop.xlane.xlu0 %1110 }
 0x1a2   : > { %v1190_v57 = vsel %vm1188_vm15, %v1111_v8, 0.0  ;;  %v1173_v4 = vmul.f32 0.015625, %v1111_v8  ;;  %v1309_v59 = vmul.f32 %v1172_v52, %v1141_v49  ;;  %v1229_v50 = vsel %vm1188_vm15, %v1141_v49, 0.0 }
 0x1a3   : > { %v1191_v56 = vadd.f32 %v1190_v57, %v1189_v27 }
 0x1a4   : > { %v1325_v5 = vsel %vm1188_vm15, %v1309_v59, 0.0 }
 0x1a9   : > { %v2626_v3 = vpop.xlane.xlu2 %1124 }
 0x1b0   : > { %v2624_v14 = vpop.xlane.xlu1 %1126 }
 0x1b1   : > { %v1206_v27 = vsel %vm1188_vm15, %v2624_v14, 0.0 }
 0x1b8   : > { %v1113_v44 = vpop.xlane.xlu1 %1112 }
 0x1b9   : > { %v1192_v40 = vsel %vm1188_vm15, %v1113_v44, 0.0  ;;  %v1174_v1 = vmul.f32 0.015625, %v1113_v44 }
 0x1ba   : > { %v1193_v16 = vadd.f32 %v1192_v40, %v1191_v56  ;;  %v1180_v40 = vmul.f32 0.015625, %v2626_v3 }
 0x1bd   : > { %v2628_v20 = vpop.xlane.xlu0 %1160 }
 0x1c0   : > { %v1115_v6 = vpop.xlane.xlu1 %1114 }
 0x1c1   : > { %v1194_v38 = vsel %vm1188_vm15, %v1115_v6, 0.0  ;;  %v1175_v61 = vmul.f32 0.015625, %v1115_v6 }
 0x1c2   : > { %v1195_v45 = vadd.f32 %v1194_v38, %v1193_v16 }
 0x1c5   : > { %v1143_v60 = vpop.xlane.xlu0 %1142  ;;  %v2630_v53 = vpop.xlane.xlu2 %1162 }
 0x1c6   : > { %v1310_v18 = vmul.f32 %v1173_v4, %v1143_v60  ;;  %v1230_v13 = vsel %vm1188_vm15, %v1143_v60, 0.0 }
 0x1c7   : > { %v1231_v15 = vadd.f32 %v1230_v13, %v1229_v50 }
 0x1c8   : > { %v1147_v47 = vpop.xlane.xlu1 %1146  ;;  %v1326_v29 = vsel %vm1188_vm15, %v1310_v18, 0.0 }
 0x1c9   : > { %v1327_v28 = vadd.f32 %v1326_v29, %v1325_v5  ;;  %v1312_v26 = vmul.f32 %v1175_v61, %v1147_v47  ;;  %v1234_v31 = vsel %vm1188_vm15, %v1147_v47, 0.0  ;;  %v1204_v47 = vsel %vm1188_vm15, %v2626_v3, 0.0 }
 0x1cb   : > { %v1330_v22 = vsel %vm1188_vm15, %v1312_v26, 0.0 }
 0x1cd   : > { %v2632_v24 = vpop.xlane.xlu0 %1128  ;;  %v1145_v58 = vpop.xlane.xlu2 %1144 }
 0x1ce   : > { %v1311_v21 = vmul.f32 %v1174_v1, %v1145_v58  ;;  %v1232_v9 = vsel %vm1188_vm15, %v1145_v58, 0.0  ;;  %v1181_v1 = vmul.f32 0.015625, %v2624_v14  ;;  %v1208_v38 = vsel %vm1188_vm15, %v2632_v24, 0.0 }
 0x1cf   : > { %v1233_v33 = vadd.f32 %v1232_v9, %v1231_v15  ;;  %v1182_v59 = vmul.f32 0.015625, %v2632_v24 }
 0x1d0   : > { %v1328_v7 = vsel %vm1188_vm15, %v1311_v21, 0.0 }
 0x1d1   : > { %v1329_v48 = vadd.f32 %v1328_v7, %v1327_v28  ;;  %v1235_v39 = vadd.f32 %v1234_v31, %v1233_v33  ;;  %v1319_v7 = vmul.f32 %v1182_v59, %v2628_v20 }
 0x1d3   : > { %v1331_v6 = vadd.f32 %v1330_v22, %v1329_v48 }
 0x1d5   : > { %v2636_v41 = vpop.xlane.xlu2 %1130  ;;  %v1117_v0 = vpop.xlane.xlu0 %1116 }
 0x1d6   : > { %v1196_v36 = vsel %vm1188_vm15, %v1117_v0, 0.0  ;;  %v1176_v2 = vmul.f32 0.015625, %v1117_v0  ;;  %v1210_v13 = vsel %vm1188_vm15, %v2636_v41, 0.0  ;;  %v1183_v24 = vmul.f32 0.015625, %v2636_v41 }
 0x1d7   : > { %v1197_v32 = vadd.f32 %v1196_v36, %v1195_v45 }
 0x1dd   : > { %v2634_v19 = vpop.xlane.xlu1 %1132  ;;  %v1119_v25 = vpop.xlane.xlu2 %1118 }
 0x1de   : > { %v1149_v30 = vpop.xlane.xlu0 %1148  ;;  %v1198_v46 = vsel %vm1188_vm15, %v1119_v25, 0.0  ;;  %v1177_v17 = vmul.f32 0.015625, %v1119_v25  ;;  %v1184_v31 = vmul.f32 0.015625, %v2634_v19 }
 0x1df   : > { %v1199_v42 = vadd.f32 %v1198_v46, %v1197_v32  ;;  %v1313_v10 = vmul.f32 %v1176_v2, %v1149_v30  ;;  %v1236_v62 = vsel %vm1188_vm15, %v1149_v30, 0.0 }
 0x1e0   : > { %v1237_v44 = vadd.f32 %v1236_v62, %v1235_v39  ;;  %v1248_v39 = vsel %vm1188_vm15, %v2628_v20, 0.0 }
 0x1e1   : > { %v1332_v23 = vsel %vm1188_vm15, %v1313_v10, 0.0 }
 0x1e2   : > { %v1333_v25 = vadd.f32 %v1332_v23, %v1331_v6 }
 0x1e5   : > { %v1121_v55 = vpop.xlane.xlu1 %1120  ;;  %v1151_v63 = vpop.xlane.xlu2 %1150 }
 0x1e6   : > { %v2644_v43 = vpop.xlane.xlu0 %1134  ;;  %v1200_v37 = vsel %vm1188_vm15, %v1121_v55, 0.0  ;;  %v1314_v11 = vmul.f32 %v1177_v17, %v1151_v63  ;;  %v1238_v49 = vsel %vm1188_vm15, %v1151_v63, 0.0  ;;  %v1178_v58 = vmul.f32 0.015625, %v1121_v55 }
 0x1e7   : > { %v1201_v51 = vadd.f32 %v1200_v37, %v1199_v42  ;;  %v1239_v30 = vadd.f32 %v1238_v49, %v1237_v44  ;;  %v1214_v42 = vsel %vm1188_vm15, %v2644_v43, 0.0  ;;  %v1320_v37 = vmul.f32 %v1183_v24, %v2630_v53 }
 0x1e8   : > { %v1334_v0 = vsel %vm1188_vm15, %v1314_v11, 0.0  ;;  %v1185_v23 = vmul.f32 0.015625, %v2644_v43  ;;  %v1250_v44 = vsel %vm1188_vm15, %v2630_v53, 0.0 }
 0x1e9   : > { %v1335_v56 = vadd.f32 %v1334_v0, %v1333_v25 }
 0x1ed   : > { %v1153_v34 = vpop.xlane.xlu1 %1152  ;;  %v1157_v12 = vpop.xlane.xlu2 %1156 }
 0x1ee   : > { %v1123_v54 = vpop.xlane.xlu0 %1122  ;;  %v1315_v4 = vmul.f32 %v1178_v58, %v1153_v34  ;;  %v1240_v55 = vsel %vm1188_vm15, %v1153_v34, 0.0  ;;  %v1317_v50 = vmul.f32 %v1180_v40, %v1157_v12  ;;  %v1212_v34 = vsel %vm1188_vm15, %v2634_v19, 0.0 }
 0x1ef   : > { %v1202_v8 = vsel %vm1188_vm15, %v1123_v54, 0.0  ;;  %v1179_v18 = vmul.f32 0.015625, %v1123_v54  ;;  %v1241_v63 = vadd.f32 %v1240_v55, %v1239_v30  ;;  %v1244_v5 = vsel %vm1188_vm15, %v1157_v12, 0.0 }
 0x1f0   : > { %v1203_v60 = vadd.f32 %v1202_v8, %v1201_v51  ;;  %v1336_v45 = vsel %vm1188_vm15, %v1315_v4, 0.0  ;;  %v1340_v10 = vsel %vm1188_vm15, %v1317_v50, 0.0  ;;  %v1344_v54 = vsel %vm1188_vm15, %v1319_v7, 0.0 }
 0x1f1   : > { %v1337_v46 = vadd.f32 %v1336_v45, %v1335_v56  ;;  %v1346_v58 = vsel %vm1188_vm15, %v1320_v37, 0.0 }
 0x1f2   : > { %v1205_v57 = vadd.f32 %v1204_v47, %v1203_v60 }
 0x1f4   : > { %v1207_v52 = vadd.f32 %v1206_v27, %v1205_v57 }
 0x1f5   : > { %v1159_v35 = vpop.xlane.xlu1 %1158  ;;  %v1137_v3 = vpop.xlane.xlu2 %1136 }
 0x1f6   : > { %v1209_v21 = vadd.f32 %v1208_v38, %v1207_v52  ;;  %v1155_v36 = vpop.xlane.xlu0 %1154  ;;  %v1318_v32 = vmul.f32 %v1181_v1, %v1159_v35  ;;  %v1246_v26 = vsel %vm1188_vm15, %v1159_v35, 0.0  ;;  %v1216_v11 = vsel %vm1188_vm15, %v1137_v3, 0.0 }
 0x1f7   : > { %v1242_v14 = vsel %vm1188_vm15, %v1155_v36, 0.0  ;;  %v1316_v29 = vmul.f32 %v1179_v18, %v1155_v36  ;;  %v1186_v20 = vmul.f32 0.015625, %v1137_v3 }
 0x1f8   : > { %v1243_v9 = vadd.f32 %v1242_v14, %v1241_v63  ;;  %v1211_v15 = vadd.f32 %v1210_v13, %v1209_v21  ;;  %v1342_v62 = vsel %vm1188_vm15, %v1318_v32, 0.0 }
 0x1f9   : > { %v1338_v61 = vsel %vm1188_vm15, %v1316_v29, 0.0 }
 0x1fa   : > { %v1245_v2 = vadd.f32 %v1244_v5, %v1243_v9  ;;  %v1339_v28 = vadd.f32 %v1338_v61, %v1337_v46  ;;  %v1213_v33 = vadd.f32 %v1212_v34, %v1211_v15 }
 0x1fc   : > { %v1247_v17 = vadd.f32 %v1246_v26, %v1245_v2  ;;  %v1341_v48 = vadd.f32 %v1340_v10, %v1339_v28  ;;  %v1215_v41 = vadd.f32 %v1214_v42, %v1213_v33 }
 0x1fd   : > { %v1165_v16 = vpop.xlane.xlu1 %1164  ;;  %v1169_v60 = vpop.xlane.xlu2 %1168 }
 0x1fe   : > { %v1343_v35 = vadd.f32 %v1342_v62, %v1341_v48  ;;  %v1217_v51 = vadd.f32 %v1216_v11, %v1215_v41  ;;  %v1167_v22 = vpop.xlane.xlu0 %1166  ;;  %v1321_v49 = vmul.f32 %v1184_v31, %v1165_v16  ;;  %v1249_v8 = vadd.f32 %v1248_v39, %v1247_v17 }
 0x1ff   : > { %v1322_v25 = vmul.f32 %v1185_v23, %v1167_v22  ;;  %v1252_v30 = vsel %vm1188_vm15, %v1165_v16, 0.0  ;;  %v1323_v4 = vmul.f32 %v1186_v20, %v1169_v60  ;;  %v1254_v40 = vsel %vm1188_vm15, %v1167_v22, 0.0 }
 0x200   : > { %v1345_v6 = vadd.f32 %v1344_v54, %v1343_v35  ;;  %v1251_v0 = vadd.f32 %v1250_v44, %v1249_v8  ;;  %v1348_v43 = vsel %vm1188_vm15, %v1321_v49, 0.0  ;;  %v1256_v55 = vsel %vm1188_vm15, %v1169_v60, 0.0 }
 0x201   : > { %v1350_v1 = vsel %vm1188_vm15, %v1322_v25, 0.0  ;;  %v1352_v16 = vsel %vm1188_vm15, %v1323_v4, 0.0  ;;  %v1366_v35 = vlaneseq }
 0x202   : > { %v1347_v57 = vadd.f32 %v1346_v58, %v1345_v6  ;;  %v1253_v27 = vadd.f32 %v1252_v30, %v1251_v0 }
 0x204   : > { %v1349_v56 = vadd.f32 %v1348_v43, %v1347_v57  ;;  %v1255_v52 = vadd.f32 %v1254_v40, %v1253_v27 }
 0x205   : > { %v1139_v12 = vpop.xlane.xlu1 %1138 }
 0x206   : > { %v1218_v19 = vsel %vm1188_vm15, %v1139_v12, 0.0  ;;  %v1187_v53 = vmul.f32 0.015625, %v1139_v12  ;;  %v1351_v38 = vadd.f32 %v1350_v1, %v1349_v56  ;;  %v1171_v18 = vpop.xlane.xlu0 %1170  ;;  %v1257_v59 = vadd.f32 %v1256_v55, %v1255_v52 }
 0x207   : > { %v1219_v47 = vadd.f32 %v1218_v19, %v1217_v51  ;;  %v1258_v13 = vsel %vm1188_vm15, %v1171_v18, 0.0  ;;  %v1367_v51 = vshrl.u32 %v1366_v35, 7 }
 0x208   : > { %v1324_v21 = vmul.f32 %v1187_v53, %v1171_v18  ;;  %v1353_v36 = vadd.f32 %v1352_v16, %v1351_v38  ;;  %v1259_v63 = vadd.f32 %v1258_v13, %v1257_v59 }
 0x209   : > { %1220 = vadd.xlane.f32.xlu1 %v1219_v47  ;;  %vm1368_vm3 = vcmp.eq.s32.totalorder %v1367_v51, 0  ;;  %vm1371_vm5 = vcmp.eq.s32.totalorder %v1367_v51, 1  ;;  %vm1375_vm0 = vcmp.eq.s32.totalorder %v1367_v51, 2 }
 0x20a   : > { %v1354_v3 = vsel %vm1188_vm15, %v1324_v21, 0.0  ;;  %1260 = vadd.xlane.f32.xlu2 %v1259_v63 }
 0x20b   : > { %v1355_v45 = vadd.f32 %v1354_v3, %v1353_v36 }
 0x20e   : > { %v1301_v50 = vpop.xlane.xlu0 %1300 }
 0x20f   : > { %v1302_v29 = vrot.slane %v1301_v50, 4 }
 0x211   : > { %1356 = vadd.xlane.f32.xlu1 %v1355_v45  ;;  %v1303_v46 = vadd.f32 %v1302_v29, %v1301_v50 }
 0x213   : > { %v1304_v32 = vrot.slane %v1303_v46, 2 }
 0x215   : > { %v1305_v26 = vadd.f32 %v1304_v32, %v1303_v46 }
 0x217   : > { %v1306_v37 = vrot.slane %v1305_v26, 1 }
 0x219   : > { %v1307_v39 = vadd.f32 %v1306_v37, %v1305_v26 }
 0x27c   : > { %v1221_v14 = vpop.xlane.xlu1 %1220 }
 0x27d   : > { %v1222_v34 = vrot.slane %v1221_v14, 4  ;;  %v1261_v5 = vpop.xlane.xlu2 %1260 }
 0x27e   : > { %v1262_v7 = vrot.slane %v1261_v5, 4 }
 0x27f   : > { %v1223_v9 = vadd.f32 %v1222_v34, %v1221_v14 }
 0x280   : > { %v1263_v42 = vadd.f32 %v1262_v7, %v1261_v5 }
 0x281   : > { %v1224_v15 = vrot.slane %v1223_v9, 2 }
 0x282   : > { %v1264_v17 = vrot.slane %v1263_v42, 2 }
 0x283   : > { %v1225_v24 = vadd.f32 %v1224_v15, %v1223_v9 }
 0x284   : > { %v1357_v2 = vpop.xlane.xlu1 %1356  ;;  %v1265_v41 = vadd.f32 %v1264_v17, %v1263_v42 }
 0x285   : > { %v1226_v61 = vrot.slane %v1225_v24, 1  ;;  %v1358_v28 = vrot.slane %v1357_v2, 4 }
 0x286   : > { %v1266_v62 = vrot.slane %v1265_v41, 1 }
 0x287   : > { %v1227_v33 = vadd.f32 %v1226_v61, %v1225_v24  ;;  %v1359_v10 = vadd.f32 %v1358_v28, %v1357_v2 }
 0x288   : > { %v1267_v12 = vadd.f32 %v1266_v62, %v1265_v41 }
 0x289   : > { %1538 = vpush %v1227_v33  ;;  %v1360_v48 = vrot.slane %v1359_v10, 2 }
 0x28a   : > { %1540 = vpush %v1267_v12 }
 0x28b   : > { %v1361_v31 = vadd.f32 %v1360_v48, %v1359_v10  ;;  %1542 = vpush %v1307_v39 }
 0x28d   : > { %v1362_v11 = vrot.slane %v1361_v31, 1 }
 0x28f   : > { %v1363_v54 = vadd.f32 %v1362_v11, %v1361_v31 }
 0x291   : > { %1544 = vpush %v1363_v54 }
 0x2ba   : > { %s1539_s8 = spop %1538 }
 0x2bb   : > { %s1541_s9 = spop %1540  ;;  %v1369_v22 = vstv %s1539_s8 }
 0x2bc   : > { %s1543_s10 = spop %1542  ;;  %v1376_v23 = vstv %s1541_s9  ;;  %v1370_v19 = vsel %vm1368_vm3, %v1369_v22, 0.0 }
 0x2bd   : > { %v1377_v6 = vsel %vm1375_vm0, %v1376_v23, 0.0 }
 0x2c2   : > { %s1545_s11 = spop %1544 }
 0x2c3   : > { %s1365_s12 = ssub.f32 %s1543_s10, %s1545_s11 }
 0x2c5   : > { %v1372_v49 = vstv %s1365_s12 }
 0x2c6   : > { %v1373_v8 = vsel %vm1371_vm5, %v1372_v49, 0.0 }
 0x2c7   : > { %v1374_v44 = vadd.f32 %v1373_v8, %v1370_v19 }
 0x2c9   : > { %v1378_v60 = vadd.f32 %v1377_v6, %v1374_v44 }
 0x2cb   : > { %1379 = vst [vmem:[%s307_s20] sm:$0xff] %v1378_v60 }
 0x2cc PF: > { %s14_s17 = sadd.s32 1, %s1673_s17   ;;  %s2789_s15 = smov %s1669_s16 }
 0x2cd   : > { %p11_p5 = scmp.ge.s32.totalorder %s14_s17, 4   ;;  %s2790_s16 = smov %s2792_s18 }
 0x2cf   :  { %13 = sbr.rel (!%p11_p5) target bundleno = 2 (0x2), region = 75 }

</bundles_post_ra>
